<compile_context>
chip_gen: v5e
topology: v5e:2x2
jax: 0.10.0
libtpu: 0.0.40
codegen_flags: <defaults>
</compile_context>

<pallas_src>
from functools import partial

import jax
import jax.numpy as jnp
from jax import lax
from jax.experimental import pallas as pl
from jax.experimental.pallas import tpu as pltpu


# ------------------------------ fused Pallas kernel ------------------------------

def _fused_unet_up_kernel(xw_ref, x1p_ref, wup_ref, bup_ref,
                          w1_ref, b1_ref, w2_ref, b2_ref, o_ref,
                          *, H2, Wup, Cup):
    """Whole unetUp forward for one image, resident in VMEM.

    xw_ref : (1, H2*Wup, C2)   bf16  low-res rows, each pixel duplicated twice along W
    x1p_ref: (1, Hup*Wup, C1)  bf16  center-padded skip, flattened NHWC
    wup_ref: (C2, 4*Cup)       bf16  deconv weight, columns ordered (dy, dx, cout)
    bup_ref: (1, Cup)          f32
    w1_ref : (3, 3*(C1+Cup), Cout) bf16  conv1 weight, kj taps stacked on K
    w2_ref : (3, 3*Cout, Cout)     bf16  conv2 weight, kj taps stacked on K
    o_ref  : (1, M2, Cout)     f32   conv2 output as "wide rows" (junk cols dropped outside)
    """
    Hup = 2 * H2
    _, M2, Cout = o_ref.shape
    Hc, Wc = Hup - 2, Wup - 2
    Hf, Wf = Hup - 4, Wup - 4
    M1 = (Hc - 1) * Wup + Wc                 # conv1 "wide" row count
    assert M2 == (Hf - 1) * Wup + Wf

    # ---- 1. 2x2 / stride-2 transposed conv: ONE MXU matmul (f32 accumulate) ----
    y = jnp.dot(xw_ref[0], wup_ref[...], preferred_element_type=jnp.float32)  # (H2*Wup, 4*Cup)
    bup = bup_ref[...]                                                        # (1, Cup) f32
    # column parity of the full-res pixel selects the dx half; dy halves are handled below.
    dx_is0 = (lax.broadcasted_iota(jnp.int32, (H2 * Wup, Cup), 0) % 2) == 0
    up0 = (jnp.where(dx_is0, y[:, 0 * Cup:1 * Cup], y[:, 1 * Cup:2 * Cup]) + bup
           ).astype(jnp.bfloat16)           # full-res rows of parity dy=0, grouped per h2
    up1 = (jnp.where(dx_is0, y[:, 2 * Cup:3 * Cup], y[:, 3 * Cup:4 * Cup]) + bup
           ).astype(jnp.bfloat16)           # parity dy=1
    # dy interleave: sublane-tile-aligned reshape/concat only (no lane<->sublane relayout).
    up = jnp.concatenate([up0.reshape(H2, Wup, Cup),
                          up1.reshape(H2, Wup, Cup)], axis=1).reshape(Hup * Wup, Cup)

    # ---- 2. channel concat [padded skip ; upsample] — never materialized in HBM ----
    cat = jnp.concatenate([x1p_ref[0], up], axis=-1)            # (Hup*Wup, C1+Cup) bf16

    # ---- 3. conv1 (3x3 VALID + bias + ReLU): 3 matmuls, K = 3*(C1+Cup) ----
    R1 = 2 * Wup + M1
    lhs1 = jnp.concatenate([cat[0:R1], cat[1:R1 + 1], cat[2:R1 + 2]], axis=-1)
    acc1 = jnp.dot(lhs1[0:M1], w1_ref[0], preferred_element_type=jnp.float32)
    acc1 += jnp.dot(lhs1[Wup:Wup + M1], w1_ref[1], preferred_element_type=jnp.float32)
    acc1 += jnp.dot(lhs1[2 * Wup:2 * Wup + M1], w1_ref[2], preferred_element_type=jnp.float32)
    h1 = jnp.maximum(acc1 + b1_ref[...], 0.0).astype(jnp.bfloat16)   # (M1, Cout), stays resident

    # ---- 4. conv2 (3x3 VALID + bias + ReLU): 3 matmuls, K = 3*Cout ----
    R2 = 2 * Wup + M2
    lhs2 = jnp.concatenate([h1[0:R2], h1[1:R2 + 1], h1[2:R2 + 2]], axis=-1)
    acc2 = jnp.dot(lhs2[0:M2], w2_ref[0], preferred_element_type=jnp.float32)
    acc2 += jnp.dot(lhs2[Wup:Wup + M2], w2_ref[1], preferred_element_type=jnp.float32)
    acc2 += jnp.dot(lhs2[2 * Wup:2 * Wup + M2], w2_ref[2], preferred_element_type=jnp.float32)

    # ---- 5. single contiguous slab store (junk columns dropped by the wrapper) ----
    o_ref[0] = jnp.maximum(acc2 + b2_ref[...], 0.0).astype(o_ref.dtype)


# --------------------------- module forward (Pallas) -------------------------

@jax.jit
def unet_up(inputs1, inputs2, params):
    """unetUp.forward(inputs1, inputs2) with is_deconv=True, NCHW in / NCHW out."""
    N, C1, H1, W1 = inputs1.shape
    _, C2, H2, W2 = inputs2.shape
    Cup = params["w_up"].shape[-1]          # out_size of the transposed conv
    Cout = params["b1"].shape[0]            # out_size of unetConv2
    Hup, Wup = 2 * H2, 2 * W2
    Ccat = C1 + Cup
    Hf, Wf = Hup - 4, Wup - 4
    M2 = (Hf - 1) * Wup + Wf

    # Low-res input, nearest-duplicated along W (smallest tensor; cheap XLA glue) so the
    # deconv is one matmul and the dx interleave is a parity select inside the kernel.
    x2n = jnp.transpose(inputs2, (0, 2, 3, 1))                              # (N,H2,W2,C2)
    xw = jnp.repeat(x2n, 2, axis=2).reshape(N, H2 * Wup, C2).astype(jnp.bfloat16)

    # Skip connection: center pad exactly like F.pad, flatten NHWC.
    offset = Hup - H1
    p = offset // 2
    x1 = jnp.transpose(inputs1, (0, 2, 3, 1))
    x1p = jnp.pad(x1, ((0, 0), (p, p), (p, p), (0, 0)))
    assert x1p.shape[1] == Hup and x1p.shape[2] == Wup, (x1p.shape, Hup, Wup)
    x1p_flat = x1p.reshape(N, Hup * Wup, C1).astype(jnp.bfloat16)

    # Weights: deconv as (C2, (dy,dx,cout)); conv weights with the 3 kj taps stacked on K.
    wup_mat = (jnp.transpose(params["w_up"], (2, 0, 1, 3))
               .reshape(C2, 4 * Cup).astype(jnp.bfloat16))
    bup = params["b_up"].reshape(1, Cup).astype(jnp.float32)
    w1m = params["w1"].reshape(3, 3 * Ccat, Cout).astype(jnp.bfloat16)
    b1 = params["b1"].reshape(1, Cout).astype(jnp.float32)
    w2m = params["w2"].reshape(3, 3 * Cout, Cout).astype(jnp.bfloat16)
    b2 = params["b2"].reshape(1, Cout).astype(jnp.float32)

    kernel = partial(_fused_unet_up_kernel, H2=H2, Wup=Wup, Cup=Cup)

    out_wide = pl.pallas_call(
        kernel,
        out_shape=jax.ShapeDtypeStruct((N, M2, Cout), jnp.float32),
        grid_spec=pltpu.PrefetchScalarGridSpec(
            num_scalar_prefetch=0,
            grid=(N,),
            in_specs=[
                pl.BlockSpec((1, H2 * Wup, C2), lambda n: (n, 0, 0)),
                pl.BlockSpec((1, Hup * Wup, C1), lambda n: (n, 0, 0)),
                pl.BlockSpec((C2, 4 * Cup), lambda n: (0, 0)),
                pl.BlockSpec((1, Cup), lambda n: (0, 0)),
                pl.BlockSpec((3, 3 * Ccat, Cout), lambda n: (0, 0, 0)),
                pl.BlockSpec((1, Cout), lambda n: (0, 0)),
                pl.BlockSpec((3, 3 * Cout, Cout), lambda n: (0, 0, 0)),
                pl.BlockSpec((1, Cout), lambda n: (0, 0)),
            ],
            out_specs=pl.BlockSpec((1, M2, Cout), lambda n: (n, 0, 0)),
        ),
        compiler_params=pltpu.CompilerParams(
            dimension_semantics=("parallel",),
            vmem_limit_bytes=32 * 1024 * 1024,
        ),
    )(xw, x1p_flat, wup_mat, bup, w1m, b1, w2m, b2)

    # Drop the junk columns of the "wide rows" and return NCHW like PyTorch.
    out_wide = jnp.pad(out_wide, ((0, 0), (0, Hf * Wup - M2), (0, 0)))
    out_nhwc = out_wide.reshape(N, Hf, Wup, Cout)[:, :, :Wf, :]
    return jnp.transpose(out_nhwc, (0, 3, 1, 2))


# ------------------------------ pure-JAX reference ---------------------------

def _ref_forward(inputs1, inputs2, params):
    x2 = jnp.transpose(inputs2, (0, 2, 3, 1)).astype(jnp.float32)
    N, H2, W2, _ = x2.shape
    Cup = params["w_up"].shape[-1]
    t = jnp.einsum("nhwc,yxcd->nhywxd", x2, params["w_up"])
    up = t.reshape(N, 2 * H2, 2 * W2, Cup) + params["b_up"]

    x1 = jnp.transpose(inputs1, (0, 2, 3, 1)).astype(jnp.float32)
    offset = 2 * H2 - x1.shape[1]
    p = offset // 2
    x1p = jnp.pad(x1, ((0, 0), (p, p), (p, p), (0, 0)))
    cat = jnp.concatenate([x1p, up], axis=-1)

    def conv3x3_valid(h, w, b):
        y = lax.conv_general_dilated(
            h, w, window_strides=(1, 1), padding="VALID",
            dimension_numbers=("NHWC", "HWIO", "NHWC"))
        return jax.nn.relu(y + b)

    h = conv3x3_valid(cat, params["w1"], params["b1"])
    h = conv3x3_valid(h, params["w2"], params["b2"])
    return jnp.transpose(h, (0, 3, 1, 2))


# ---------------------------------- params -----------------------------------

def _make_params(key, in_size, out_size, skip_channels):
    ks = jax.random.split(key, 6)
    # cat([skip, upsampled]) has skip_channels + out_size channels; with
    # skip_channels = in_size - out_size this equals in_size, matching unetConv2.
    ccat = skip_channels + out_size
    return {
        # ConvTranspose2d(in_size, out_size, 2, 2) weight as (dy, dx, cin, cout)
        "w_up": 0.1 * jax.random.normal(ks[0], (2, 2, in_size, out_size), jnp.float32),
        "b_up": 0.1 * jax.random.normal(ks[1], (out_size,), jnp.float32),
        # unetConv2 conv1 / conv2 weights in HWIO, biases per output channel
        "w1": 0.1 * jax.random.normal(ks[2], (3, 3, ccat, out_size), jnp.float32),
        "b1": 0.1 * jax.random.normal(ks[3], (out_size,), jnp.float32),
        "w2": 0.1 * jax.random.normal(ks[4], (3, 3, out_size, out_size), jnp.float32),
        "b2": 0.1 * jax.random.normal(ks[5], (out_size,), jnp.float32),
    }


# ----------------------------------- main -------------------------------------

if __name__ == "__main__":
    key = jax.random.PRNGKey(0)
    k1, k2, kp = jax.random.split(key, 3)

    in_size, out_size = 16, 8            # unetUp(in_size=16, out_size=8, is_deconv=True)
    N, H2, W2 = 2, 8, 8                  # inputs2: low-res decoder feature
    C1 = in_size - out_size              # skip channels so cat has in_size channels
    H1, W1 = 2 * H2, 2 * W2              # inputs1: skip feature (offset == 0)

    inputs1 = jax.random.normal(k1, (N, C1, H1, W1), jnp.float32)   # NCHW
    inputs2 = jax.random.normal(k2, (N, in_size, H2, W2), jnp.float32)
    params = _make_params(kp, in_size, out_size, C1)

    out = unet_up(inputs1, inputs2, params)
    out = jax.block_until_ready(out)

    ref = _ref_forward(inputs1, inputs2, params)
    assert out.shape == (N, out_size, H1 - 4, W1 - 4), out.shape
    max_err = float(jnp.max(jnp.abs(out - ref)))
    assert jnp.allclose(out, ref, atol=5e-2, rtol=5e-2), max_err

    print("KERNEL_OK")
</pallas_src>

<mosaic_0001>
module attributes {stable_mosaic.version = 11 : i64} {
  func.func @_fused_unet_up_kernel(%arg0: i32, %arg1: memref<1x128x16xbf16, #tpu.memory_space<vmem>>, %arg2: memref<1x256x8xbf16, #tpu.memory_space<vmem>>, %arg3: memref<16x32xbf16, #tpu.memory_space<vmem>>, %arg4: memref<1x8xf32, #tpu.memory_space<vmem>>, %arg5: memref<3x48x8xbf16, #tpu.memory_space<vmem>>, %arg6: memref<1x8xf32, #tpu.memory_space<vmem>>, %arg7: memref<3x24x8xbf16, #tpu.memory_space<vmem>>, %arg8: memref<1x8xf32, #tpu.memory_space<vmem>>, %arg9: memref<1x188x8xf32, #tpu.memory_space<vmem>>) attributes {dimension_semantics = [#tpu.dimension_semantics<parallel>], iteration_bounds = array<i64: 2>, scalar_prefetch = 0 : i64, scratch_operands = 0 : i64, tpu.core_type = #tpu.core_type<tc>, window_params = [{transform_indices = @transform_0, window_bounds = array<i64: 1, 128, 16>}, {transform_indices = @transform_1, window_bounds = array<i64: 1, 256, 8>}, {pipeline_mode = #tpu.pipeline_mode<synchronous>, transform_indices = @transform_2, window_bounds = array<i64: 16, 32>}, {pipeline_mode = #tpu.pipeline_mode<synchronous>, transform_indices = @transform_3, window_bounds = array<i64: 1, 8>}, {pipeline_mode = #tpu.pipeline_mode<synchronous>, transform_indices = @transform_4, window_bounds = array<i64: 3, 48, 8>}, {pipeline_mode = #tpu.pipeline_mode<synchronous>, transform_indices = @transform_5, window_bounds = array<i64: 1, 8>}, {pipeline_mode = #tpu.pipeline_mode<synchronous>, transform_indices = @transform_6, window_bounds = array<i64: 3, 24, 8>}, {pipeline_mode = #tpu.pipeline_mode<synchronous>, transform_indices = @transform_7, window_bounds = array<i64: 1, 8>}, {transform_indices = @transform_8, window_bounds = array<i64: 1, 188, 8>}]} {
    %c0 = arith.constant 0 : index
    %c0_0 = arith.constant 0 : index
    %c0_1 = arith.constant 0 : index
    %0 = vector.load %arg1[%c0, %c0_0, %c0_1] : memref<1x128x16xbf16, #tpu.memory_space<vmem>>, vector<1x128x16xbf16>
    %1 = vector.shape_cast %0 : vector<1x128x16xbf16> to vector<128x16xbf16>
    %c0_2 = arith.constant 0 : index
    %c0_3 = arith.constant 0 : index
    %2 = vector.load %arg3[%c0_2, %c0_3] : memref<16x32xbf16, #tpu.memory_space<vmem>>, vector<16x32xbf16>
    %cst = arith.constant dense<0.000000e+00> : vector<128x32xf32>
    %3 = tpu.matmul %1, %2, %cst {dimension_numbers = #tpu.dot_dimension_numbers<[1], [0], [0], [1], [0, 0, 1, 1], [], []>} : vector<128x16xbf16>, vector<16x32xbf16>, vector<128x32xf32> -> vector<128x32xf32>
    %c0_4 = arith.constant 0 : index
    %c0_5 = arith.constant 0 : index
    %4 = vector.load %arg4[%c0_4, %c0_5] : memref<1x8xf32, #tpu.memory_space<vmem>>, vector<1x8xf32>
    %5 = tpu.iota {dimensions = array<i32: 0>} : vector<128x8xi32>
    %c2_i32 = arith.constant 2 : i32
    %c0_i32 = arith.constant 0 : i32
    %6 = arith.cmpi eq, %c2_i32, %c0_i32 : i32
    %c1_i32 = arith.constant 1 : i32
    %7 = arith.select %6, %c1_i32, %c2_i32 : i32
    %8 = vector.broadcast %7 : i32 to vector<128x8xi32>
    %9 = arith.remsi %5, %8 : vector<128x8xi32>
    %c0_i32_6 = arith.constant 0 : i32
    %10 = vector.broadcast %c0_i32_6 : i32 to vector<128x8xi32>
    %11 = arith.cmpi ne, %9, %10 : vector<128x8xi32>
    %c0_i32_7 = arith.constant 0 : i32
    %12 = vector.broadcast %c0_i32_7 : i32 to vector<128x8xi32>
    %13 = arith.cmpi slt, %9, %12 : vector<128x8xi32>
    %c0_i32_8 = arith.constant 0 : i32
    %14 = arith.cmpi slt, %7, %c0_i32_8 : i32
    %15 = vector.broadcast %14 : i1 to vector<128x8xi1>
    %16 = vector.broadcast %15 : vector<128x8xi1> to vector<128x8xi1>
    %17 = arith.xori %13, %16 : vector<128x8xi1>
    %18 = arith.andi %17, %11 : vector<128x8xi1>
    %19 = vector.broadcast %7 : i32 to vector<128x8xi32>
    %20 = arith.addi %9, %19 : vector<128x8xi32>
    %21 = arith.select %18, %20, %9 : vector<128x8xi1>, vector<128x8xi32>
    %c0_i32_9 = arith.constant 0 : i32
    %22 = vector.broadcast %c0_i32_9 : i32 to vector<128x8xi32>
    %23 = arith.cmpi eq, %21, %22 : vector<128x8xi32>
    %24 = vector.extract_strided_slice %3 {offsets = [0, 0], sizes = [128, 8], strides = [1, 1]} : vector<128x32xf32> to vector<128x8xf32>
    %25 = vector.extract_strided_slice %3 {offsets = [0, 8], sizes = [128, 8], strides = [1, 1]} : vector<128x32xf32> to vector<128x8xf32>
    %26 = arith.select %23, %24, %25 : vector<128x8xi1>, vector<128x8xf32>
    %27 = vector.broadcast %4 : vector<1x8xf32> to vector<128x8xf32>
    %28 = arith.addf %26, %27 : vector<128x8xf32>
    %29 = arith.truncf %28 : vector<128x8xf32> to vector<128x8xbf16>
    %30 = vector.extract_strided_slice %3 {offsets = [0, 16], sizes = [128, 8], strides = [1, 1]} : vector<128x32xf32> to vector<128x8xf32>
    %31 = vector.extract_strided_slice %3 {offsets = [0, 24], sizes = [128, 8], strides = [1, 1]} : vector<128x32xf32> to vector<128x8xf32>
    %32 = arith.select %23, %30, %31 : vector<128x8xi1>, vector<128x8xf32>
    %33 = vector.broadcast %4 : vector<1x8xf32> to vector<128x8xf32>
    %34 = arith.addf %32, %33 : vector<128x8xf32>
    %35 = arith.truncf %34 : vector<128x8xf32> to vector<128x8xbf16>
    %36 = vector.shape_cast %29 : vector<128x8xbf16> to vector<8x16x8xbf16>
    %37 = vector.shape_cast %35 : vector<128x8xbf16> to vector<8x16x8xbf16>
    %38 = tpu.concatenate %36, %37 in 1 : vector<8x16x8xbf16>, vector<8x16x8xbf16> -> vector<8x32x8xbf16>
    %39 = vector.shape_cast %38 : vector<8x32x8xbf16> to vector<256x8xbf16>
    %c0_10 = arith.constant 0 : index
    %c0_11 = arith.constant 0 : index
    %c0_12 = arith.constant 0 : index
    %40 = vector.load %arg2[%c0_10, %c0_11, %c0_12] : memref<1x256x8xbf16, #tpu.memory_space<vmem>>, vector<1x256x8xbf16>
    %41 = vector.shape_cast %40 : vector<1x256x8xbf16> to vector<256x8xbf16>
    %42 = tpu.concatenate %41, %39 in 1 : vector<256x8xbf16>, vector<256x8xbf16> -> vector<256x16xbf16>
    %43 = vector.extract_strided_slice %42 {offsets = [0, 0], sizes = [254, 16], strides = [1, 1]} : vector<256x16xbf16> to vector<254x16xbf16>
    %44 = vector.extract_strided_slice %42 {offsets = [1, 0], sizes = [254, 16], strides = [1, 1]} : vector<256x16xbf16> to vector<254x16xbf16>
    %45 = vector.extract_strided_slice %42 {offsets = [2, 0], sizes = [254, 16], strides = [1, 1]} : vector<256x16xbf16> to vector<254x16xbf16>
    %46 = tpu.concatenate %43, %44, %45 in 1 : vector<254x16xbf16>, vector<254x16xbf16>, vector<254x16xbf16> -> vector<254x48xbf16>
    %47 = vector.extract_strided_slice %46 {offsets = [0, 0], sizes = [222, 48], strides = [1, 1]} : vector<254x48xbf16> to vector<222x48xbf16>
    %c0_13 = arith.constant 0 : index
    %c0_14 = arith.constant 0 : index
    %c0_15 = arith.constant 0 : index
    %48 = vector.load %arg5[%c0_13, %c0_14, %c0_15] : memref<3x48x8xbf16, #tpu.memory_space<vmem>>, vector<1x48x8xbf16>
    %49 = vector.shape_cast %48 : vector<1x48x8xbf16> to vector<48x8xbf16>
    %cst_16 = arith.constant dense<0.000000e+00> : vector<222x8xf32>
    %50 = tpu.matmul %47, %49, %cst_16 {dimension_numbers = #tpu.dot_dimension_numbers<[1], [0], [0], [1], [0, 0, 1, 1], [], []>} : vector<222x48xbf16>, vector<48x8xbf16>, vector<222x8xf32> -> vector<222x8xf32>
    %51 = vector.extract_strided_slice %46 {offsets = [16, 0], sizes = [222, 48], strides = [1, 1]} : vector<254x48xbf16> to vector<222x48xbf16>
    %c1 = arith.constant 1 : index
    %c0_17 = arith.constant 0 : index
    %c0_18 = arith.constant 0 : index
    %52 = vector.load %arg5[%c1, %c0_17, %c0_18] : memref<3x48x8xbf16, #tpu.memory_space<vmem>>, vector<1x48x8xbf16>
    %53 = vector.shape_cast %52 : vector<1x48x8xbf16> to vector<48x8xbf16>
    %cst_19 = arith.constant dense<0.000000e+00> : vector<222x8xf32>
    %54 = tpu.matmul %51, %53, %cst_19 {dimension_numbers = #tpu.dot_dimension_numbers<[1], [0], [0], [1], [0, 0, 1, 1], [], []>} : vector<222x48xbf16>, vector<48x8xbf16>, vector<222x8xf32> -> vector<222x8xf32>
    %55 = arith.addf %50, %54 : vector<222x8xf32>
    %56 = vector.extract_strided_slice %46 {offsets = [32, 0], sizes = [222, 48], strides = [1, 1]} : vector<254x48xbf16> to vector<222x48xbf16>
    %c2 = arith.constant 2 : index
    %c0_20 = arith.constant 0 : index
    %c0_21 = arith.constant 0 : index
    %57 = vector.load %arg5[%c2, %c0_20, %c0_21] : memref<3x48x8xbf16, #tpu.memory_space<vmem>>, vector<1x48x8xbf16>
    %58 = vector.shape_cast %57 : vector<1x48x8xbf16> to vector<48x8xbf16>
    %cst_22 = arith.constant dense<0.000000e+00> : vector<222x8xf32>
    %59 = tpu.matmul %56, %58, %cst_22 {dimension_numbers = #tpu.dot_dimension_numbers<[1], [0], [0], [1], [0, 0, 1, 1], [], []>} : vector<222x48xbf16>, vector<48x8xbf16>, vector<222x8xf32> -> vector<222x8xf32>
    %60 = arith.addf %55, %59 : vector<222x8xf32>
    %c0_23 = arith.constant 0 : index
    %c0_24 = arith.constant 0 : index
    %61 = vector.load %arg6[%c0_23, %c0_24] : memref<1x8xf32, #tpu.memory_space<vmem>>, vector<1x8xf32>
    %62 = vector.broadcast %61 : vector<1x8xf32> to vector<222x8xf32>
    %63 = arith.addf %60, %62 : vector<222x8xf32>
    %cst_25 = arith.constant 0.000000e+00 : f32
    %64 = vector.broadcast %cst_25 : f32 to vector<222x8xf32>
    %65 = arith.maximumf %63, %64 : vector<222x8xf32>
    %66 = arith.truncf %65 : vector<222x8xf32> to vector<222x8xbf16>
    %67 = vector.extract_strided_slice %66 {offsets = [0, 0], sizes = [220, 8], strides = [1, 1]} : vector<222x8xbf16> to vector<220x8xbf16>
    %68 = vector.extract_strided_slice %66 {offsets = [1, 0], sizes = [220, 8], strides = [1, 1]} : vector<222x8xbf16> to vector<220x8xbf16>
    %69 = vector.extract_strided_slice %66 {offsets = [2, 0], sizes = [220, 8], strides = [1, 1]} : vector<222x8xbf16> to vector<220x8xbf16>
    %70 = tpu.concatenate %67, %68, %69 in 1 : vector<220x8xbf16>, vector<220x8xbf16>, vector<220x8xbf16> -> vector<220x24xbf16>
    %71 = vector.extract_strided_slice %70 {offsets = [0, 0], sizes = [188, 24], strides = [1, 1]} : vector<220x24xbf16> to vector<188x24xbf16>
    %c0_26 = arith.constant 0 : index
    %c0_27 = arith.constant 0 : index
    %c0_28 = arith.constant 0 : index
    %72 = vector.load %arg7[%c0_26, %c0_27, %c0_28] : memref<3x24x8xbf16, #tpu.memory_space<vmem>>, vector<1x24x8xbf16>
    %73 = vector.shape_cast %72 : vector<1x24x8xbf16> to vector<24x8xbf16>
    %cst_29 = arith.constant dense<0.000000e+00> : vector<188x8xf32>
    %74 = tpu.matmul %71, %73, %cst_29 {dimension_numbers = #tpu.dot_dimension_numbers<[1], [0], [0], [1], [0, 0, 1, 1], [], []>} : vector<188x24xbf16>, vector<24x8xbf16>, vector<188x8xf32> -> vector<188x8xf32>
    %75 = vector.extract_strided_slice %70 {offsets = [16, 0], sizes = [188, 24], strides = [1, 1]} : vector<220x24xbf16> to vector<188x24xbf16>
    %c1_30 = arith.constant 1 : index
    %c0_31 = arith.constant 0 : index
    %c0_32 = arith.constant 0 : index
    %76 = vector.load %arg7[%c1_30, %c0_31, %c0_32] : memref<3x24x8xbf16, #tpu.memory_space<vmem>>, vector<1x24x8xbf16>
    %77 = vector.shape_cast %76 : vector<1x24x8xbf16> to vector<24x8xbf16>
    %cst_33 = arith.constant dense<0.000000e+00> : vector<188x8xf32>
    %78 = tpu.matmul %75, %77, %cst_33 {dimension_numbers = #tpu.dot_dimension_numbers<[1], [0], [0], [1], [0, 0, 1, 1], [], []>} : vector<188x24xbf16>, vector<24x8xbf16>, vector<188x8xf32> -> vector<188x8xf32>
    %79 = arith.addf %74, %78 : vector<188x8xf32>
    %80 = vector.extract_strided_slice %70 {offsets = [32, 0], sizes = [188, 24], strides = [1, 1]} : vector<220x24xbf16> to vector<188x24xbf16>
    %c2_34 = arith.constant 2 : index
    %c0_35 = arith.constant 0 : index
    %c0_36 = arith.constant 0 : index
    %81 = vector.load %arg7[%c2_34, %c0_35, %c0_36] : memref<3x24x8xbf16, #tpu.memory_space<vmem>>, vector<1x24x8xbf16>
    %82 = vector.shape_cast %81 : vector<1x24x8xbf16> to vector<24x8xbf16>
    %cst_37 = arith.constant dense<0.000000e+00> : vector<188x8xf32>
    %83 = tpu.matmul %80, %82, %cst_37 {dimension_numbers = #tpu.dot_dimension_numbers<[1], [0], [0], [1], [0, 0, 1, 1], [], []>} : vector<188x24xbf16>, vector<24x8xbf16>, vector<188x8xf32> -> vector<188x8xf32>
    %84 = arith.addf %79, %83 : vector<188x8xf32>
    %c0_38 = arith.constant 0 : index
    %c0_39 = arith.constant 0 : index
    %85 = vector.load %arg8[%c0_38, %c0_39] : memref<1x8xf32, #tpu.memory_space<vmem>>, vector<1x8xf32>
    %86 = vector.broadcast %85 : vector<1x8xf32> to vector<188x8xf32>
    %87 = arith.addf %84, %86 : vector<188x8xf32>
    %cst_40 = arith.constant 0.000000e+00 : f32
    %88 = vector.broadcast %cst_40 : f32 to vector<188x8xf32>
    %89 = arith.maximumf %87, %88 : vector<188x8xf32>
    %c0_41 = arith.constant 0 : index
    %c0_42 = arith.constant 0 : index
    %c0_43 = arith.constant 0 : index
    %90 = vector.load %arg9[%c0_41, %c0_42, %c0_43] : memref<1x188x8xf32, #tpu.memory_space<vmem>>, vector<1x188x8xf32>
    %91 = vector.shape_cast %90 : vector<1x188x8xf32> to vector<188x8xf32>
    %92 = vector.shape_cast %89 : vector<188x8xf32> to vector<1x188x8xf32>
    tpu.vector_store %arg9[%c0_41, %c0_42, %c0_43], %92 {strides = array<i32>} : memref<1x188x8xf32, #tpu.memory_space<vmem>>, vector<1x188x8xf32>,
    return
  }
  func.func @transform_0(%arg0: i32) -> (i32, i32, i32) {
    %c0_i32 = arith.constant 0 : i32
    %c0_i32_0 = arith.constant 0 : i32
    %c0_i32_1 = arith.constant 0 : i32
    return %arg0, %c0_i32, %c0_i32_0 : i32, i32, i32
  }
  func.func @transform_1(%arg0: i32) -> (i32, i32, i32) {
    %c0_i32 = arith.constant 0 : i32
    %c0_i32_0 = arith.constant 0 : i32
    %c0_i32_1 = arith.constant 0 : i32
    return %arg0, %c0_i32, %c0_i32_0 : i32, i32, i32
  }
  func.func @transform_2(%arg0: i32) -> (i32, i32) {
    %c0_i32 = arith.constant 0 : i32
    %c0_i32_0 = arith.constant 0 : i32
    %c0_i32_1 = arith.constant 0 : i32
    return %c0_i32, %c0_i32_0 : i32, i32
  }
  func.func @transform_3(%arg0: i32) -> (i32, i32) {
    %c0_i32 = arith.constant 0 : i32
    %c0_i32_0 = arith.constant 0 : i32
    %c0_i32_1 = arith.constant 0 : i32
    return %c0_i32, %c0_i32_0 : i32, i32
  }
  func.func @transform_4(%arg0: i32) -> (i32, i32, i32) {
    %c0_i32 = arith.constant 0 : i32
    %c0_i32_0 = arith.constant 0 : i32
    %c0_i32_1 = arith.constant 0 : i32
    %c0_i32_2 = arith.constant 0 : i32
    return %c0_i32, %c0_i32_0, %c0_i32_1 : i32, i32, i32
  }
  func.func @transform_5(%arg0: i32) -> (i32, i32) {
    %c0_i32 = arith.constant 0 : i32
    %c0_i32_0 = arith.constant 0 : i32
    %c0_i32_1 = arith.constant 0 : i32
    return %c0_i32, %c0_i32_0 : i32, i32
  }
  func.func @transform_6(%arg0: i32) -> (i32, i32, i32) {
    %c0_i32 = arith.constant 0 : i32
    %c0_i32_0 = arith.constant 0 : i32
    %c0_i32_1 = arith.constant 0 : i32
    %c0_i32_2 = arith.constant 0 : i32
    return %c0_i32, %c0_i32_0, %c0_i32_1 : i32, i32, i32
  }
  func.func @transform_7(%arg0: i32) -> (i32, i32) {
    %c0_i32 = arith.constant 0 : i32
    %c0_i32_0 = arith.constant 0 : i32
    %c0_i32_1 = arith.constant 0 : i32
    return %c0_i32, %c0_i32_0 : i32, i32
  }
  func.func @transform_8(%arg0: i32) -> (i32, i32, i32) {
    %c0_i32 = arith.constant 0 : i32
    %c0_i32_0 = arith.constant 0 : i32
    %c0_i32_1 = arith.constant 0 : i32
    return %arg0, %c0_i32, %c0_i32_0 : i32, i32, i32
  }
}

</mosaic_0001>

<bundles_post_ra>
// kernel: unet_up.1
= control target key start
LH: loop header
LB: loop body
LE: loop exit
PB: predicated region body
PF: predicated region fallthrough
CT: control target
= control target key end

     0   :  { %s3035_s27 = smov 0   ;;  %s3972_s0 = inlined_call_operand.vmem [shape: bf16[2,128,16], index: 0, kind: input, shape index: {}]   ;;  %s3973_s1 = inlined_call_operand.vmem [shape: bf16[2,256,8], index: 1, kind: input, shape index: {}]   ;;  %s3974_s2 = inlined_call_operand.vmem [shape: bf16[16,32], index: 2, kind: input, shape index: {}]   ;;  %s3975_s3 = inlined_call_operand.vmem [shape: f32[1,8], index: 3, kind: input, shape index: {}]   ;;  %s3976_s4 = inlined_call_operand.vmem [shape: bf16[3,48,8], index: 4, kind: input, shape index: {}]   ;;  %s3977_s5 = inlined_call_operand.vmem [shape: f32[1,8], index: 5, kind: input, shape index: {}]   ;;  %s3978_s6 = inlined_call_operand.vmem [shape: bf16[3,24,8], index: 6, kind: input, shape index: {}]   ;;  %s3979_s7 = inlined_call_operand.vmem [shape: f32[1,8], index: 7, kind: input, shape index: {}]   ;;  %s3980_s8 = inlined_call_operand.vmem [shape: f32[2,188,8], index: 8, kind: output, shape index: {}]  }
   0x1 LB: > { %s2651_s28 = sadd.s32 4294967295, %s2983_s27   ;;  %p2655_p0 = scmp.ge.s32.totalorder %s2983_s27, 1  ;;  %s2983_s27 = sphi %s3035_s27, %s18_s27  }
   0x2   : > { %p272_p1 = scmp.lt.s32.totalorder %s2983_s27, 3 }
   0x4   : > { %p273_p2 = pnand %p2655_p0, %p272_p1 }
   0x5   : > { %p311_p3 = scmp.lt.s32.totalorder (!%p273_p2), %s2651_s28, 1  ;;  %s2985_s15 = smov (!%p273_p2), 16  }
   0x6   : > { %276 = sbr.rel (%p273_p2) target bundleno = 1703 (0x6a7), region = 52  ;;  %s2986_s16 = smov (!%p273_p2), 120  }
   0x7   : > { %s2987_s17 = smov (!%p273_p2), 112   ;;  %s2988_s18 = smov (!%p273_p2), 8  }
   0x8   : > { %s2989_s23 = smov (!%p273_p2), 32  }
   0xb   : > { %v2925_v0 = vld [vmem:[%s3974_s2] sm:$0xff]  ;;  %s3982_s28 = smov (!%p311_p3, %s2651_s28), 1  ;;  %vm391_vm0 = vcmask 130048   ;;  %v466_v26 = vlaneseq  ;;  %vm1081_vm9 = vcmask 64512   ;;  %vm1290_vm10 = vcmask 1046528  }
   0xc   : > { %423 = vmatpush.bf16.msra.mxu0 %v2925_v0  ;;  %s2915_s9 = sshll.u32 %s3982_s28, 6  ;;  %v3077_v16 = vld [vmem:[%s3975_s3] ss:$0 sm:$0xff]  ;;  %s2916_s19 = sshll.u32 %s3982_s28, 7  ;;  %vm1130_vm11 = vsmask.f32 7424 }
   0xd   : > { %s315_s12 = scalar_lea.vmem %s3972_s0, %s2915_s9  ;;  %806 = vrot.lane.b32.xlu1 %v3077_v16, %s2985_s15  ;;  %v3099_v27 = vshrl.u32 %v466_v26, 7  ;;  %s3161_s22 = scalar_lea.vmem %s3973_s1, %s2916_s19  ;;  %vm1386_vm14 = vcmask 261120   ;;  %vm1450_vm15 = vcmask 392192  }
   0xe   : > { %v2917_v1 = vld [vmem:[%s315_s12] sm:$0xff]  ;;  %v2918_v2 = vld [vmem:[%s315_s12 + $0x8] sm:$0xff]  ;;  %v2919_v3 = vld [vmem:[%s315_s12 + $0x10] sm:$0xff]  ;;  %s2960_s20 = smul.u32 192, %s3982_s28 }
   0xf   : > { %2697 = vmatmul.msk.bf16.vlgmr.msra.gmra.mxu0 %vm391_vm0, %v2917_v1  ;;  %v2920_v4 = vld [vmem:[%s315_s12 + $0x18] sm:$0xff]  ;;  %v2921_v5 = vld [vmem:[%s315_s12 + $0x20] sm:$0xff]  ;;  %v2922_v6 = vld [vmem:[%s315_s12 + $0x28] sm:$0xff]  ;;  %v477_v28 = vadd.s32 80, %v3099_v27  ;;  %v480_v30 = vadd.s32 104, %v3099_v27  ;;  %v478_v31 = vadd.s32 88, %v3099_v27 }
  0x10   : > { %v2923_v7 = vld [vmem:[%s315_s12 + $0x30] sm:$0xff]  ;;  %v2924_v8 = vld [vmem:[%s315_s12 + $0x38] sm:$0xff]  ;;  %v479_v37 = vadd.s32 96, %v3099_v27  ;;  %s3872_s25 = scalar_lea.vmem %s3980_s8, %s2960_s20 }
  0x11   : > { %v557_v29 = vand.u32 1, %v477_v28  ;;  %v578_v33 = vand.u32 1, %v480_v30  ;;  %v564_v34 = vand.u32 1, %v478_v31 }
  0x12   : > { %v571_v44 = vand.u32 1, %v479_v37 }
  0x13   : > { %vm685_vm1 = vcmp.eq.s32.totalorder %v557_v29, 0  ;;  %vm688_vm2 = vcmp.eq.s32.totalorder %v578_v33, 0  ;;  %vm686_vm3 = vcmp.eq.s32.totalorder %v564_v34, 0 }
  0x14   : > { %vm687_vm4 = vcmp.eq.s32.totalorder %v571_v44, 0 }
  0x1f   : > { %2698 = vmatmul.msk.bf16.gmra.mxu0 %vm391_vm0, %v2918_v2 }
  0x2f   : > { %2699 = vmatmul.msk.bf16.gmra.mxu0 %vm391_vm0, %v2919_v3 }
  0x3f   : > { %2700 = vmatmul.msk.bf16.gmra.mxu0 %vm391_vm0, %v2920_v4 }
  0x4f   : > { %2701 = vmatmul.msk.bf16.gmra.mxu0 %vm391_vm0, %v2921_v5 }
  0x5f   : > { %2702 = vmatmul.msk.bf16.gmra.mxu0 %vm391_vm0, %v2922_v6 }
  0x6f   : > { %2703 = vmatmul.msk.bf16.gmra.mxu0 %vm391_vm0, %v2923_v7 }
  0x7f   : > { %2704 = vmatmul.msk.bf16.gmra.mxu0 %vm391_vm0, %v2924_v8  ;;  %v3104_v36 = vpop.permute.xlu1 %806 }
  0x8c   : > { %v3060_v9 = vpop.f32.mrf.mxu0 }
  0x94   : > { %v3062_v10 = vpop.f32.mrf.mxu0 }
  0x9c   : > { %v3064_v11 = vpop.f32.mrf.mxu0 }
  0xa4   : > { %v3066_v12 = vpop.f32.mrf.mxu0 }
  0xac   : > { %v3068_v13 = vpop.f32.mrf.mxu0 }
  0xb4   : > { %v3070_v14 = vpop.f32.mrf.mxu0 }
  0xbc   : > { %v3072_v15 = vpop.f32.mrf.mxu0 }
  0xc4   : > { %v3081_v17 = vpop.f32.mrf.mxu0 }
  0xcc   : > { %v3083_v18 = vpop.f32.mrf.mxu0 }
  0xd4   : > { %v3085_v19 = vpop.f32.mrf.mxu0 }
  0xdc   : > { %v450_v20 = vpop.f32.mrf.mxu0 }
  0xdd   : > { %727 = vrot.lane.b32.xlu0 %v450_v20, %s2986_s16 }
  0xe4   : > { %v452_v21 = vpop.f32.mrf.mxu0 }
  0xe5   : > { %729 = vrot.lane.b32.xlu0 %v452_v21, %s2986_s16 }
  0xec   : > { %v455_v22 = vpop.f32.mrf.mxu0 }
  0xed   : > { %731 = vrot.lane.b32.xlu1 %v455_v22, %s2986_s16 }
  0xf4   : > { %v457_v23 = vpop.f32.mrf.mxu0 }
  0xf5   : > { %733 = vrot.lane.b32.xlu2 %v457_v23, %s2986_s16 }
  0xfc   : > { %v3091_v24 = vpop.f32.mrf.mxu0 }
  0xfd   : > { %735 = vrot.lane.b32.xlu0 %v3091_v24, %s2986_s16 }
 0x104   : > { %v3095_v25 = vpop.f32.mrf.mxu0 }
 0x105   : > { %737 = vrot.lane.b32.xlu1 %v3095_v25, %s2986_s16 }
 0x14f   : > { %v728_v32 = vpop.permute.xlu0 %727  ;;  %v734_v39 = vpop.permute.xlu2 %733 }
 0x150   : > { %v765_v35 = vsel %vm685_vm1, %v450_v20, %v728_v32  ;;  %v768_v42 = vsel %vm688_vm2, %v457_v23, %v734_v39  ;;  %v481_v20 = vadd.s32 112, %v3099_v27 }
 0x151   : > { %v784_v38 = vadd.f32 %v3077_v16, %v765_v35  ;;  %v819_v40 = vadd.f32 %v3104_v36, %v765_v35  ;;  %v787_v51 = vadd.f32 %v3077_v16, %v768_v42  ;;  %v822_v52 = vadd.f32 %v3104_v36, %v768_v42 }
 0x153   : > { %v800_v45 = vpack.c.bf16 %v784_v38, %v784_v38  ;;  %v835_v48 = vpack.c.bf16 %v819_v40, %v819_v40  ;;  %v803_v61 = vpack.c.bf16 %v787_v51, %v787_v51  ;;  %v838_v0 = vpack.c.bf16 %v822_v52, %v822_v52 }
 0x154   : > { %v469_v51 = vadd.s32 16, %v3099_v27 }
 0x155   : > { %v3113_v53 = vunpack.c.l.b16 %v800_v45  ;;  %v907_v56 = vunpack.c.l.b16 %v835_v48  ;;  %v870_v3 = vunpack.c.l.b16 %v803_v61  ;;  %v910_v6 = vunpack.c.l.b16 %v838_v0 }
 0x157   : > { %v730_v41 = vpop.permute.xlu0 %729 }
 0x158   : > { %v766_v43 = vsel %vm686_vm3, %v452_v21, %v730_v41  ;;  %v585_v21 = vand.u32 1, %v481_v20 }
 0x159   : > { %v785_v46 = vadd.f32 %v3077_v16, %v766_v43  ;;  %v820_v47 = vadd.f32 %v3104_v36, %v766_v43 }
 0x15a   : > { %vm689_vm5 = vcmp.eq.s32.totalorder %v585_v21, 0 }
 0x15b   : > { %v801_v49 = vpack.c.bf16 %v785_v46, %v785_v46  ;;  %v836_v50 = vpack.c.bf16 %v820_v47, %v820_v47 }
 0x15d   : > { %v3115_v54 = vunpack.c.l.b16 %v801_v49  ;;  %v908_v55 = vunpack.c.l.b16 %v836_v50  ;;  %v470_v49 = vadd.s32 24, %v3099_v27 }
 0x15f   : > { %v732_v57 = vpop.permute.xlu1 %731  ;;  %v918_v58 = vpack.c.b16 %v908_v55, %v907_v56  ;;  %v878_v59 = vpack.c.b16 %v3115_v54, %v3113_v53  ;;  %v508_v50 = vand.u32 1, %v470_v49  ;;  %v501_v56 = vand.u32 1, %v469_v51 }
 0x160   : > { %v767_v60 = vsel %vm687_vm4, %v455_v22, %v732_v57  ;;  %v482_v22 = vadd.s32 120, %v3099_v27 }
 0x161   : > { %v786_v62 = vadd.f32 %v3077_v16, %v767_v60  ;;  %v821_v63 = vadd.f32 %v3104_v36, %v767_v60  ;;  %931 = vrot.lane.b32.xlu2 %v918_v58, %s2987_s17  ;;  %vm678_vm7 = vcmp.eq.s32.totalorder %v508_v50, 0  ;;  %vm677_vm8 = vcmp.eq.s32.totalorder %v501_v56, 0 }
 0x162   : > { %v592_v26 = vand.u32 1, %v482_v22  ;;  %v487_v22 = vand.u32 1, %v3099_v27 }
 0x163   : > { %v802_v1 = vpack.c.bf16 %v786_v62, %v786_v62  ;;  %v837_v2 = vpack.c.bf16 %v821_v63, %v821_v63 }
 0x164   : > { %vm690_vm6 = vcmp.eq.s32.totalorder %v592_v26, 0  ;;  %vm675_vm12 = vcmp.eq.s32.totalorder %v487_v22, 0 }
 0x165   : > { %v869_v4 = vunpack.c.l.b16 %v802_v1  ;;  %v909_v5 = vunpack.c.l.b16 %v837_v2 }
 0x167   : > { %v919_v7 = vpack.c.b16 %v910_v6, %v909_v5  ;;  %v879_v8 = vpack.c.b16 %v870_v3, %v869_v4 }
 0x169   : > { %933 = vrot.lane.b32.xlu2 %v919_v7, %s2987_s17  ;;  %1073 = vrot.lane.b32.xlu1 %v879_v8, %s2988_s18 }
 0x16f   : > { %v736_v23 = vpop.permute.xlu0 %735 }
 0x170   : > { %v769_v28 = vsel %vm689_vm5, %v3091_v24, %v736_v23 }
 0x171   : > { %v788_v29 = vadd.f32 %v3077_v16, %v769_v28  ;;  %v823_v30 = vadd.f32 %v3104_v36, %v769_v28 }
 0x173   : > { %v804_v33 = vpack.c.bf16 %v788_v29, %v788_v29  ;;  %v839_v34 = vpack.c.bf16 %v823_v30, %v823_v30  ;;  %v2939_v29 = vld [vmem:[%s3161_s22 + $0x68] sm:$0xff] }
 0x175   : > { %v871_v40 = vunpack.c.l.b16 %v804_v33  ;;  %v911_v41 = vunpack.c.l.b16 %v839_v34  ;;  %v2940_v33 = vld [vmem:[%s3161_s22 + $0x70] sm:$0xff] }
 0x177   : > { %v738_v31 = vpop.permute.xlu1 %737 }
 0x178   : > { %v770_v32 = vsel %vm690_vm6, %v3095_v25, %v738_v31 }
 0x179   : > { %v789_v35 = vadd.f32 %v3077_v16, %v770_v32  ;;  %v824_v37 = vadd.f32 %v3104_v36, %v770_v32  ;;  %v468_v32 = vadd.s32 8, %v3099_v27 }
 0x17b   : > { %v805_v38 = vpack.c.bf16 %v789_v35, %v789_v35  ;;  %v840_v39 = vpack.c.bf16 %v824_v37, %v824_v37 }
 0x17d   : > { %v872_v42 = vunpack.c.l.b16 %v805_v38  ;;  %v912_v24 = vunpack.c.l.b16 %v840_v39 }
 0x17f   : > { %v920_v43 = vpack.c.b16 %v912_v24, %v911_v41  ;;  %v880_v44 = vpack.c.b16 %v872_v42, %v871_v40  ;;  %v494_v40 = vand.u32 1, %v468_v32 }
 0x181   : > { %935 = vrot.lane.b32.xlu2 %v920_v43, %s2987_s17  ;;  %1077 = vrot.lane.b32.xlu1 %v880_v44, %s2988_s18  ;;  %vm676_vm13 = vcmp.eq.s32.totalorder %v494_v40, 0 }
 0x189   : > { %707 = vrot.lane.b32.xlu2 %v3060_v9, %s2986_s16  ;;  %711 = vrot.lane.b32.xlu1 %v3064_v11, %s2986_s16 }
 0x191   : > { %713 = vrot.lane.b32.xlu2 %v3066_v12, %s2986_s16 }
 0x1bb   : > { %v932_v25 = vpop.permute.xlu2 %931 }
 0x1bc   : > { %1071 = vrot.lane.b32.xlu0 %v932_v25, %s2988_s18 }
 0x1c3   : > { %v934_v45 = vpop.permute.xlu2 %933 }
 0x1c4   : > { %1075 = vrot.lane.b32.xlu0 %v934_v45, %s2988_s18 }
 0x1cc   : > { %709 = vrot.lane.b32.xlu0 %v3062_v10, %s2986_s16 }
 0x1db   : > { %v936_v46 = vpop.permute.xlu2 %935  ;;  %v1074_v48 = vpop.permute.xlu1 %1073 }
 0x1dc   : > { %1079 = vrot.lane.b32.xlu2 %v936_v46, %s2988_s18 }
 0x1e3   : > { %v708_v47 = vpop.permute.xlu2 %707 }
 0x1e4   : > { %v755_v42 = vsel %vm675_vm12, %v3060_v9, %v708_v47 }
 0x1e5   : > { %v774_v45 = vadd.f32 %v3077_v16, %v755_v42  ;;  %v809_v51 = vadd.f32 %v3104_v36, %v755_v42  ;;  %v2946_v42 = vld [vmem:[%s3976_s4 + $0x20] sm:$0xff] }
 0x1e7   : > { %v790_v54 = vpack.c.bf16 %v774_v45, %v774_v45 }
 0x1eb   : > { %v714_v52 = vpop.permute.xlu2 %713 }
 0x1ec   : > { %v758_v57 = vsel %vm678_vm7, %v3066_v12, %v714_v52  ;;  %v2937_v12 = vld [vmem:[%s3161_s22 + $0x58] sm:$0xff]  ;;  %vm2240_vm7 = vcmask 1043456  }
 0x1ed   : > { %v777_v58 = vadd.f32 %v3077_v16, %v758_v57  ;;  %v812_v52 = vadd.f32 %v3104_v36, %v758_v57 }
 0x1ef   : > { %v793_v62 = vpack.c.bf16 %v777_v58, %v777_v58 }
 0x1f1   : > { %v3151_v1 = vunpack.c.l.b16 %v793_v62 }
 0x1f3   : > { %v1078_v55 = vpop.permute.xlu1 %1077 }
 0x1f4   : > { %v3197_v24 = vsel %vm1081_vm9, %v2940_v33, %v1078_v55 }
 0x1f5   : > { %v1228_v46 = vshll.u32 %v3197_v24, 16 }
 0x1f7   : > { %v1230_v56 = vrot.slane %v1228_v46, 1  ;;  %v2936_v46 = vld [vmem:[%s3161_s22 + $0x50] sm:$0xff] }
 0x1fb   : > { %v712_v60 = vpop.permute.xlu1 %711 }
 0x1fc   : > { %v757_v61 = vsel %vm677_vm8, %v3064_v11, %v712_v60  ;;  %v2938_v11 = vld [vmem:[%s3161_s22 + $0x60] sm:$0xff]  ;;  %vm2215_vm8 = vcmask 195584  }
 0x1fd   : > { %v776_v63 = vadd.f32 %v3077_v16, %v757_v61  ;;  %v3166_v4 = vsel %vm1081_vm9, %v2938_v11, %v1074_v48  ;;  %v811_v47 = vadd.f32 %v3104_v36, %v757_v61 }
 0x1fe   : > { %v1214_v7 = vshll.u32 %v3166_v4, 16  ;;  %v1314_v8 = vrot.slane %v3166_v4, 1  ;;  %v1218_v41 = vshrl.u32 %v3166_v4, 16 }
 0x1ff   : > { %v792_v0 = vpack.c.bf16 %v776_v63, %v776_v63  ;;  %v827_v58 = vpack.c.bf16 %v811_v47, %v811_v47  ;;  %v825_v63 = vpack.c.bf16 %v809_v51, %v809_v51 }
 0x200   : > { %v1216_v31 = vrot.slane %v1214_v7, 1 }
 0x201   : > { %v3153_v2 = vunpack.c.l.b16 %v792_v0  ;;  %v828_v0 = vpack.c.bf16 %v812_v52, %v812_v52  ;;  %v899_v11 = vunpack.c.l.b16 %v827_v58  ;;  %v897_v7 = vunpack.c.l.b16 %v825_v63 }
 0x202   : > { %v1220_v25 = vor.u32 %v1218_v41, %v1216_v31 }
 0x203   : > { %v874_v3 = vpack.c.b16 %v3151_v1, %v3153_v2 }
 0x22e   : > { %v1072_v5 = vpop.permute.xlu0 %1071 }
 0x22f   : > { %v3169_v6 = vsel %vm1081_vm9, %v2937_v12, %v1072_v5 }
 0x230   : > { %v1207_v20 = vshll.u32 %v3169_v6, 16  ;;  %v1312_v21 = vrot.slane %v3169_v6, 1  ;;  %v1211_v26 = vshrl.u32 %v3169_v6, 16 }
 0x232   : > { %v3176_v23 = vrot.slane %v1207_v20, 1  ;;  %v1315_v28 = vsel %vm1290_vm10, %v1312_v21, %v1314_v8  ;;  %v2941_v20 = vld [vmem:[%s3161_s22 + $0x78] sm:$0xff] }
 0x233   : > { %1344 = vrot.lane.b32.xlu1 %v1315_v28, %s2989_s23 }
 0x234   : > { %v1213_v30 = vor.u32 %v1211_v26, %v3176_v23 }
 0x236   : > { %v1076_v34 = vpop.permute.xlu0 %1075  ;;  %v1217_v35 = vsel %vm1130_vm11, %v1213_v30, %v1216_v31  ;;  %v1080_v22 = vpop.permute.xlu2 %1079  ;;  %v1318_v30 = vrot.slane %v3197_v24, 1 }
 0x237   : > { %v3189_v37 = vsel %vm1081_vm9, %v2939_v29, %v1076_v34  ;;  %1264 = vrot.lane.b32.xlu0 %v1217_v35, %s2985_s15  ;;  %v3230_v29 = vsel %vm1081_vm9, %v2941_v20, %v1080_v22  ;;  %v1232_v34 = vshrl.u32 %v3197_v24, 16 }
 0x238   : > { %v1221_v38 = vshll.u32 %v3189_v37, 16  ;;  %v1316_v39 = vrot.slane %v3189_v37, 1  ;;  %v1225_v9 = vshrl.u32 %v3189_v37, 16  ;;  %v1235_v31 = vshll.u32 %v3230_v29, 16 }
 0x239   : > { %v1320_v32 = vrot.slane %v3230_v29, 1  ;;  %v1234_v40 = vor.u32 %v1232_v34, %v1230_v56 }
 0x23a   : > { %v1317_v43 = vsel %vm1290_vm10, %v1314_v8, %v1316_v39  ;;  %v1223_v44 = vrot.slane %v1221_v38, 1  ;;  %v900_v8 = vunpack.c.l.b16 %v828_v0  ;;  %v1319_v33 = vsel %vm1290_vm10, %v1316_v39, %v1318_v30  ;;  %v2947_v39 = vld [vmem:[%s3976_s4 + $0x28] sm:$0xff] }
 0x23b   : > { %1346 = vrot.lane.b32.xlu2 %v1317_v43, %s2989_s23  ;;  %1069 = vrot.lane.b32.xlu1 %v878_v59, %s2988_s18  ;;  %v1321_v35 = vsel %vm1290_vm10, %v1318_v30, %v1320_v32  ;;  %v3243_v38 = vrot.slane %v1235_v31, 1  ;;  %v2945_v43 = vld [vmem:[%s3976_s4 + $0x18] sm:$0xff]  ;;  %v473_v30 = vadd.s32 48, %v3099_v27 }
 0x23c   : > { %v1224_v49 = vsel %vm1130_vm11, %v1220_v25, %v1223_v44  ;;  %v1227_v50 = vor.u32 %v1225_v9, %v1223_v44  ;;  %v914_v28 = vpack.c.b16 %v900_v8, %v899_v11  ;;  %2954 = vmatpush.bf16.msra.mxu3 %v2947_v39  ;;  %1484 = vmatpush.bf16.msra.mxu1 %v2947_v39 }
 0x23d   : > { %v1238_v41 = vsel %vm1130_vm11, %v1234_v40, %v3243_v38  ;;  %v529_v40 = vand.u32 1, %v473_v30 }
 0x23e   : > { %v710_v48 = vpop.permute.xlu0 %709  ;;  %v1231_v62 = vsel %vm1130_vm11, %v1227_v50, %v1230_v56 }
 0x23f   : > { %v756_v53 = vsel %vm676_vm13, %v3062_v10, %v710_v48  ;;  %1266 = vrot.lane.b32.xlu0 %v1224_v49, %s2985_s15  ;;  %v3220_v10 = vunpack.c.l.b16 %v790_v54  ;;  %v472_v48 = vadd.s32 40, %v3099_v27  ;;  %vm681_vm3 = vcmp.eq.s32.totalorder %v529_v40, 0 }
 0x240   : > { %v775_v59 = vadd.f32 %v3077_v16, %v756_v53  ;;  %v810_v55 = vadd.f32 %v3104_v36, %v756_v53  ;;  %2955 = vmatpush.bf16.msra.mxu3 %v2946_v42  ;;  %1485 = vmatpush.bf16.msra.mxu1 %v2946_v42  ;;  %v471_v53 = vadd.s32 32, %v3099_v27  ;;  %v475_v40 = vadd.s32 64, %v3099_v27 }
 0x241   : > { %v522_v52 = vand.u32 1, %v472_v48 }
 0x242   : > { %v791_v60 = vpack.c.bf16 %v775_v59, %v775_v59  ;;  %v826_v61 = vpack.c.bf16 %v810_v55, %v810_v55 }
 0x243   : > { %717 = vrot.lane.b32.xlu1 %v3070_v14, %s2986_s16  ;;  %1268 = vrot.lane.b32.xlu2 %v1231_v62, %s2985_s15  ;;  %vm680_vm1 = vcmp.eq.s32.totalorder %v522_v52, 0 }
 0x244   : > { %v3222_v57 = vunpack.c.l.b16 %v791_v60  ;;  %v898_v12 = vunpack.c.l.b16 %v826_v61  ;;  %2956 = vmatpush.bf16.msra.mxu3 %v2945_v43  ;;  %1486 = vmatpush.bf16.msra.mxu1 %v2945_v43  ;;  %v515_v61 = vand.u32 1, %v471_v53 }
 0x246   : > { %v873_v5 = vpack.c.b16 %v3222_v57, %v3220_v10  ;;  %v913_v26 = vpack.c.b16 %v898_v12, %v897_v7  ;;  %vm679_vm2 = vcmp.eq.s32.totalorder %v515_v61, 0  ;;  %v474_v10 = vadd.s32 56, %v3099_v27 }
 0x247   : > { %715 = vrot.lane.b32.xlu0 %v3068_v13, %s2986_s16 }
 0x24b   : > { %921 = vrot.lane.b32.xlu1 %v913_v26, %s2987_s17  ;;  %923 = vrot.lane.b32.xlu2 %v914_v28, %s2987_s17 }
 0x24f   : > { %1348 = vrot.lane.b32.xlu0 %v1319_v33, %s2989_s23 }
 0x253   : > { %1350 = vrot.lane.b32.xlu1 %v1321_v35, %s2989_s23  ;;  %719 = vrot.lane.b32.xlu2 %v3072_v15, %s2986_s16 }
 0x257   : > { %1270 = vrot.lane.b32.xlu0 %v1238_v41, %s2985_s15 }
 0x25f   : > { %721 = vrot.lane.b32.xlu0 %v3081_v17, %s2986_s16 }
 0x295   : > { %v1347_v9 = vpop.permute.xlu2 %1346 }
 0x29d   : > { %v1269_v62 = vpop.permute.xlu2 %1268 }
 0x29e   : > { %v1381_v42 = vsel %vm391_vm0, %v3189_v37, %v1269_v62 }
 0x2a5   : > { %v1345_v44 = vpop.permute.xlu1 %1344 }
 0x2a9   : > { %v1265_v25 = vpop.permute.xlu0 %1264 }
 0x2aa   : > { %v1377_v45 = vsel %vm391_vm0, %v3169_v6, %v1265_v25  ;;  %v536_v25 = vand.u32 1, %v474_v10 }
 0x2ab   : > { %v3266_v47 = vsel %vm1386_vm14, %v1377_v45, %v1345_v44 }
 0x2ac   : > { %2797 = vmatmul.msk.bf16.vlgmr.msra.gmra.mxu3 %vm1450_vm15, %v3266_v47  ;;  %vm682_vm4 = vcmp.eq.s32.totalorder %v536_v25, 0  ;;  %v2928_v25 = vld [vmem:[%s3161_s22 + $0x10] sm:$0xff] }
 0x2ad   : > { %v1070_v49 = vpop.permute.xlu1 %1069 }
 0x2ae   : > { %v3272_v50 = vsel %vm1081_vm9, %v2936_v46, %v1070_v49 }
 0x2af   : > { %v1200_v51 = vshll.u32 %v3272_v50, 16  ;;  %v1310_v54 = vrot.slane %v3272_v50, 1  ;;  %v1204_v55 = vshrl.u32 %v3272_v50, 16 }
 0x2b1   : > { %v3277_v59 = vrot.slane %v1200_v51, 1  ;;  %v1267_v56 = vpop.permute.xlu0 %1266  ;;  %v1313_v58 = vsel %vm1290_vm10, %v1310_v54, %v1312_v21 }
 0x2b2   : > { %1342 = vrot.lane.b32.xlu2 %v1313_v58, %s2989_s23  ;;  %v1379_v21 = vsel %vm391_vm0, %v3166_v4, %v1267_v56  ;;  %v924_v4 = vpop.permute.xlu2 %923 }
 0x2b3   : > { %v1206_v60 = vor.u32 %v1204_v55, %v3277_v59  ;;  %v3297_v22 = vsel %vm1386_vm14, %v1379_v21, %v1347_v9 }
 0x2b5   : > { %v718_v63 = vpop.permute.xlu1 %717  ;;  %v1210_v0 = vsel %vm1130_vm11, %v1206_v60, %v3176_v23 }
 0x2b6   : > { %v760_v11 = vsel %vm680_vm1, %v3070_v14, %v718_v63  ;;  %1262 = vrot.lane.b32.xlu1 %v1210_v0, %s2985_s15  ;;  %v2944_v0 = vld [vmem:[%s3976_s4 + $0x10] sm:$0xff] }
 0x2b7   : > { %v814_v6 = vadd.f32 %v3104_v36, %v760_v11  ;;  %v779_v34 = vadd.f32 %v3077_v16, %v760_v11  ;;  %2957 = vmatpush.bf16.msrb.mxu3 %v2944_v0  ;;  %1583 = vmatpush.bf16.msra.mxu2 %v2944_v0  ;;  %v2942_v11 = vld [vmem:[%s3976_s4] sm:$0xff] }
 0x2b9   : > { %v716_v12 = vpop.permute.xlu0 %715  ;;  %v830_v8 = vpack.c.bf16 %v814_v6, %v814_v6  ;;  %v795_v41 = vpack.c.bf16 %v779_v34, %v779_v34 }
 0x2ba   : > { %v759_v7 = vsel %vm679_vm2, %v3068_v13, %v716_v12 }
 0x2bb   : > { %v813_v20 = vadd.f32 %v3104_v36, %v759_v7  ;;  %v902_v13 = vunpack.c.l.b16 %v830_v8  ;;  %v778_v28 = vadd.f32 %v3077_v16, %v759_v7  ;;  %v862_v43 = vunpack.c.l.b16 %v795_v41  ;;  %v2927_v8 = vld [vmem:[%s3161_s22 + $0x8] sm:$0xff] }
 0x2bc   : > { %2798 = vmatmul.msk.bf16.gmra.mxu3 %vm1450_vm15, %v3297_v22 }
 0x2bd   : > { %v829_v14 = vpack.c.bf16 %v813_v20, %v813_v20  ;;  %v922_v23 = vpop.permute.xlu1 %921  ;;  %v794_v35 = vpack.c.bf16 %v778_v28, %v778_v28 }
 0x2be   : > { %1049 = vrot.lane.b32.xlu1 %v873_v5, %s2988_s18  ;;  %1051 = vrot.lane.b32.xlu2 %v922_v23, %s2988_s18  ;;  %v720_v5 = vpop.permute.xlu2 %719 }
 0x2bf   : > { %v901_v26 = vunpack.c.l.b16 %v829_v14  ;;  %v861_v57 = vunpack.c.l.b16 %v794_v35  ;;  %v761_v45 = vsel %vm681_vm3, %v3072_v15, %v720_v5  ;;  %v2926_v14 = vld [vmem:[%s3161_s22] sm:$0xff]  ;;  %v2929_v5 = vld [vmem:[%s3161_s22 + $0x18] sm:$0xff] }
 0x2c0   : > { %v780_v37 = vadd.f32 %v3077_v16, %v761_v45  ;;  %v815_v9 = vadd.f32 %v3104_v36, %v761_v45  ;;  %v476_v45 = vadd.s32 72, %v3099_v27 }
 0x2c1   : > { %v1349_v31 = vpop.permute.xlu0 %1348  ;;  %v915_v33 = vpack.c.b16 %v902_v13, %v901_v26  ;;  %v875_v46 = vpack.c.b16 %v862_v43, %v861_v57 }
 0x2c2   : > { %v3321_v44 = vsel %vm1386_vm14, %v1381_v42, %v1349_v31  ;;  %v796_v2 = vpack.c.bf16 %v780_v37, %v780_v37  ;;  %v543_v42 = vand.u32 1, %v475_v40 }
 0x2c3   : > { %925 = vrot.lane.b32.xlu0 %v915_v33, %s2987_s17 }
 0x2c4   : > { %v863_v53 = vunpack.c.l.b16 %v796_v2  ;;  %vm683_vm5 = vcmp.eq.s32.totalorder %v543_v42, 0 }
 0x2c5   : > { %v1351_v62 = vpop.permute.xlu1 %1350 }
 0x2c6   : > { %1055 = vrot.lane.b32.xlu1 %v924_v4, %s2988_s18  ;;  %723 = vrot.lane.b32.xlu2 %v3083_v18, %s2986_s16 }
 0x2c9   : > { %v1271_v39 = vpop.permute.xlu0 %1270 }
 0x2ca   : > { %v1383_v60 = vsel %vm391_vm0, %v3197_v24, %v1271_v39  ;;  %v2943_v24 = vld [vmem:[%s3976_s4 + $0x8] sm:$0xff] }
 0x2cb   : > { %1053 = vrot.lane.b32.xlu0 %v874_v3, %s2988_s18  ;;  %v831_v3 = vpack.c.bf16 %v815_v9, %v815_v9  ;;  %v3338_v63 = vsel %vm1386_vm14, %v1383_v60, %v1351_v62  ;;  %2958 = vmatpush.bf16.msrb.mxu3 %v2943_v24 }
 0x2cc   : > { %2799 = vmatmul.msk.bf16.gmra.mxu3 %vm1450_vm15, %v3321_v44  ;;  %1584 = vmatpush.bf16.msra.mxu2 %v2943_v24 }
 0x2cd   : > { %v903_v55 = vunpack.c.l.b16 %v831_v3 }
 0x2ce   : > { %1057 = vrot.lane.b32.xlu1 %v875_v46, %s2988_s18 }
 0x2cf   : > { %2959 = vmatpush.bf16.msrb.mxu3 %v2942_v11 }
 0x2d0   : > { %1585 = vmatpush.bf16.msra.mxu2 %v2942_v11 }
 0x2d1   : > { %v722_v48 = vpop.permute.xlu0 %721 }
 0x2d2   : > { %v762_v1 = vsel %vm682_vm4, %v3081_v17, %v722_v48 }
 0x2d3   : > { %v781_v49 = vadd.f32 %v3077_v16, %v762_v1  ;;  %v816_v15 = vadd.f32 %v3104_v36, %v762_v1  ;;  %725 = vrot.lane.b32.xlu0 %v3085_v19, %s2986_s16  ;;  %v550_v1 = vand.u32 1, %v476_v45  ;;  %v2948_v45 = vld [vmem:[%s3976_s4 + $0x30] sm:$0xff] }
 0x2d5   : > { %v797_v51 = vpack.c.bf16 %v781_v49, %v781_v49  ;;  %v832_v52 = vpack.c.bf16 %v816_v15, %v816_v15  ;;  %vm684_vm6 = vcmp.eq.s32.totalorder %v550_v1, 0  ;;  %v2931_v1 = vld [vmem:[%s3161_s22 + $0x28] sm:$0xff] }
 0x2d7   : > { %v864_v56 = vunpack.c.l.b16 %v797_v51  ;;  %v904_v58 = vunpack.c.l.b16 %v832_v52 }
 0x2d9   : > { %v916_v61 = vpack.c.b16 %v904_v58, %v903_v55  ;;  %v876_v17 = vpack.c.b16 %v864_v56, %v863_v53 }
 0x2db   : > { %927 = vrot.lane.b32.xlu2 %v916_v61, %s2987_s17 }
 0x2dc   : > { %2800 = vmatmul.msk.bf16.gmra.mxu3 %vm1450_vm15, %v3338_v63 }
 0x30c   : > { %v1343_v6 = vpop.permute.xlu2 %1342 }
 0x318   : > { %v1052_v20 = vpop.permute.xlu2 %1051 }
 0x319   : > { %v3361_v23 = vsel %vm1081_vm9, %v2927_v8, %v1052_v20 }
 0x31a   : > { %v1137_v26 = vshll.u32 %v3361_v23, 16  ;;  %v1292_v28 = vrot.slane %v3361_v23, 1  ;;  %v1141_v11 = vshrl.u32 %v3361_v23, 16 }
 0x31c   : > { %v1139_v57 = vrot.slane %v1137_v26, 1 }
 0x320   : > { %v724_v37 = vpop.permute.xlu2 %723 }
 0x321   : > { %v763_v15 = vsel %vm683_vm5, %v3083_v18, %v724_v37 }
 0x322   : > { %v817_v55 = vadd.f32 %v3104_v36, %v763_v15 }
 0x324   : > { %v833_v18 = vpack.c.bf16 %v817_v55, %v817_v55 }
 0x326   : > { %v905_v8 = vunpack.c.l.b16 %v833_v18 }
 0x328   : > { %v1263_v21 = vpop.permute.xlu1 %1262 }
 0x329   : > { %v1375_v12 = vsel %vm391_vm0, %v3272_v50, %v1263_v21 }
 0x32a   : > { %v3354_v7 = vsel %vm1386_vm14, %v1375_v12, %v1343_v6 }
 0x32b   : > { %2823 = vmatmul.msk.bf16.vlgmr.msrb.gmra.mxu3 %vm1450_vm15, %v3354_v7 }
 0x330   : > { %v1050_v4 = vpop.permute.xlu1 %1049 }
 0x331   : > { %v3364_v13 = vsel %vm1081_vm9, %v2926_v14, %v1050_v4 }
 0x332   : > { %v1133_v30 = vshll.u32 %v3364_v13, 16  ;;  %v1291_v31 = vrot.slane %v3364_v13, 1  ;;  %v1131_v33 = vshrl.u32 %v3364_v13, 16 }
 0x334   : > { %v1135_v34 = vrot.slane %v1133_v30, 1  ;;  %v1293_v35 = vsel %vm1290_vm10, %v1291_v31, %v1292_v28 }
 0x335   : > { %v926_v41 = vpop.permute.xlu0 %925  ;;  %1322 = vrot.lane.b32.xlu2 %v1293_v35, %s2989_s23 }
 0x336   : > { %1059 = vrot.lane.b32.xlu0 %v926_v41, %s2988_s18  ;;  %v1136_v10 = vor.u32 %v1135_v34, %v1131_v33  ;;  %v782_v34 = vadd.f32 %v3077_v16, %v763_v15 }
 0x338   : > { %v1140_v39 = vsel %vm1130_vm11, %v1136_v10, %v1139_v57  ;;  %v1056_v43 = vpop.permute.xlu1 %1055  ;;  %v928_v10 = vpop.permute.xlu2 %927 }
 0x339   : > { %1242 = vrot.lane.b32.xlu1 %v1140_v39, %s2985_s15  ;;  %v3383_v46 = vsel %vm1081_vm9, %v2929_v5, %v1056_v43  ;;  %v2949_v43 = vld [vmem:[%s3976_s4 + $0x38] sm:$0xff] }
 0x33a   : > { %v1151_v2 = vshll.u32 %v3383_v46, 16  ;;  %v1296_v27 = vrot.slane %v3383_v46, 1 }
 0x33b   : > { %2824 = vmatmul.msk.bf16.gmra.mxu3 %vm1450_vm15, %v3266_v47 }
 0x33c   : > { %v1153_v58 = vrot.slane %v1151_v2, 1 }
 0x33d   : > { %v1054_v9 = vpop.permute.xlu0 %1053  ;;  %1061 = vrot.lane.b32.xlu2 %v876_v17, %s2988_s18  ;;  %v2930_v17 = vld [vmem:[%s3161_s22 + $0x20] sm:$0xff] }
 0x33e   : > { %v3387_v48 = vsel %vm1081_vm9, %v2928_v25, %v1054_v9  ;;  %v3436_v9 = vpop.f32.mrf.mxu3 }
 0x33f   : > { %v1144_v3 = vshll.u32 %v3387_v48, 16  ;;  %v1294_v49 = vrot.slane %v3387_v48, 1  ;;  %v1148_v52 = vshrl.u32 %v3387_v48, 16 }
 0x340   : > { %v1058_v0 = vpop.permute.xlu1 %1057 }
 0x341   : > { %v1146_v51 = vrot.slane %v1144_v3, 1  ;;  %v1297_v53 = vsel %vm1290_vm10, %v1294_v49, %v1296_v27  ;;  %v1295_v21 = vsel %vm1290_vm10, %v1292_v28, %v1294_v49  ;;  %v3406_v12 = vsel %vm1081_vm9, %v2930_v17, %v1058_v0  ;;  %v2933_v0 = vld [vmem:[%s3161_s22 + $0x38] sm:$0xff] }
 0x342   : > { %1326 = vrot.lane.b32.xlu1 %v1297_v53, %s2989_s23  ;;  %v1158_v14 = vshll.u32 %v3406_v12, 16  ;;  %v1155_v28 = vshrl.u32 %v3383_v46, 16  ;;  %v1162_v15 = vshrl.u32 %v3406_v12, 16 }
 0x343   : > { %v1150_v56 = vor.u32 %v1148_v52, %v1146_v51 }
 0x344   : > { %v1160_v33 = vrot.slane %v1158_v14, 1  ;;  %v1157_v35 = vor.u32 %v1155_v28, %v1153_v58  ;;  %v2934_v28 = vld [vmem:[%s3161_s22 + $0x40] sm:$0xff] }
 0x345   : > { %v726_v60 = vpop.permute.xlu0 %725  ;;  %v1154_v61 = vsel %vm1130_vm11, %v1150_v56, %v1153_v58 }
 0x346   : > { %v764_v62 = vsel %vm684_vm6, %v3085_v19, %v726_v60  ;;  %1246 = vrot.lane.b32.xlu0 %v1154_v61, %s2985_s15  ;;  %v1143_v19 = vor.u32 %v1141_v11, %v1139_v57  ;;  %v1161_v41 = vsel %vm1130_vm11, %v1157_v35, %v1160_v33  ;;  %v798_v57 = vpack.c.bf16 %v782_v34, %v782_v34  ;;  %v3447_v55 = vpop.f32.mrf.mxu3 }
 0x347   : > { %v818_v24 = vadd.f32 %v3104_v36, %v764_v62  ;;  %v1298_v36 = vrot.slane %v3406_v12, 1  ;;  %v783_v30 = vadd.f32 %v3077_v16, %v764_v62  ;;  %v2950_v16 = vld [vmem:[%s3976_s4 + $0x40] sm:$0xff]  ;;  %v1164_v60 = vor.u32 %v1162_v15, %v1160_v33 }
 0x348   : > { %v1147_v4 = vsel %vm1130_vm11, %v1143_v19, %v1146_v51  ;;  %v865_v39 = vunpack.c.l.b16 %v798_v57  ;;  %1689 = vmatpush.bf16.msra.mxu3 %v2950_v16 }
 0x349   : > { %v834_v6 = vpack.c.bf16 %v818_v24, %v818_v24  ;;  %v1299_v31 = vsel %vm1290_vm10, %v1296_v27, %v1298_v36  ;;  %v799_v40 = vpack.c.bf16 %v783_v30, %v783_v30  ;;  %v2932_v27 = vld [vmem:[%s3161_s22 + $0x30] sm:$0xff] }
 0x34a   : > { %1324 = vrot.lane.b32.xlu1 %v1295_v21, %s2989_s23 }
 0x34b   : > { %v906_v20 = vunpack.c.l.b16 %v834_v6  ;;  %2825 = vmatmul.msk.bf16.gmra.mxu3 %vm1450_vm15, %v3297_v22  ;;  %v866_v5 = vunpack.c.l.b16 %v799_v40 }
 0x34c   : > { %1690 = vmatpush.bf16.msra.mxu3 %v2949_v43 }
 0x34d   : > { %v917_v26 = vpack.c.b16 %v906_v20, %v905_v8  ;;  %v877_v42 = vpack.c.b16 %v866_v5, %v865_v39 }
 0x34e   : > { %1244 = vrot.lane.b32.xlu0 %v1147_v4, %s2985_s15  ;;  %v3470_v4 = vpop.f32.mrf.mxu3 }
 0x34f   : > { %929 = vrot.lane.b32.xlu2 %v917_v26, %s2987_s17 }
 0x350   : > { %1691 = vmatpush.bf16.msra.mxu3 %v2948_v45 }
 0x352   : > { %1328 = vrot.lane.b32.xlu1 %v1299_v31, %s2989_s23 }
 0x356   : > { %1248 = vrot.lane.b32.xlu0 %v1161_v41, %s2985_s15 }
 0x357   : > { %1063 = vrot.lane.b32.xlu2 %v928_v10, %s2988_s18 }
 0x35b   : > { %2826 = vmatmul.msk.bf16.gmra.mxu3 %vm1450_vm15, %v3321_v44 }
 0x35f   : > { %1065 = vrot.lane.b32.xlu2 %v877_v42, %s2988_s18 }
 0x38f   : > { %v1323_v25 = vpop.permute.xlu2 %1322 }
 0x397   : > { %v1062_v37 = vpop.permute.xlu2 %1061 }
 0x398   : > { %v3453_v17 = vsel %vm1081_vm9, %v2932_v27, %v1062_v37  ;;  %v3491_v37 = vpop.f32.mrf.mxu3 }
 0x399   : > { %v1302_v6 = vrot.slane %v3453_v17, 1  ;;  %v1176_v40 = vshrl.u32 %v3453_v17, 16 }
 0x3a8   : > { %v1060_v2 = vpop.permute.xlu0 %1059 }
 0x3a9   : > { %v3441_v3 = vsel %vm1081_vm9, %v2931_v1, %v1060_v2  ;;  %v930_v49 = vpop.permute.xlu2 %929 }
 0x3aa   : > { %v1165_v51 = vshll.u32 %v3441_v3, 16  ;;  %v1300_v52 = vrot.slane %v3441_v3, 1  ;;  %1067 = vrot.lane.b32.xlu2 %v930_v49, %s2988_s18  ;;  %v1169_v24 = vshrl.u32 %v3441_v3, 16 }
 0x3ab   : > { %v1243_v53 = vpop.permute.xlu1 %1242 }
 0x3ac   : > { %v1355_v56 = vsel %vm391_vm0, %v3364_v13, %v1243_v53  ;;  %v1301_v58 = vsel %vm1290_vm10, %v1298_v36, %v1300_v52  ;;  %v1167_v61 = vrot.slane %v1165_v51, 1  ;;  %v1172_v13 = vshll.u32 %v3453_v17, 16 }
 0x3ad   : > { %1330 = vrot.lane.b32.xlu1 %v1301_v58, %s2989_s23  ;;  %v1388_v62 = vsel %vm1386_vm14, %v1355_v56, %v1323_v25  ;;  %v1303_v20 = vsel %vm1290_vm10, %v1300_v52, %v1302_v6  ;;  %v3504_v56 = vpop.f32.mrf.mxu3 }
 0x3ae   : > { %2813 = vmatmul.msk.bf16.vlgmr.msra.gmra.mxu2 %vm1450_vm15, %v1388_v62  ;;  %v1168_v18 = vsel %vm1130_vm11, %v1164_v60, %v1167_v61  ;;  %v1171_v8 = vor.u32 %v1169_v24, %v1167_v61  ;;  %v1174_v19 = vrot.slane %v1172_v13, 1 }
 0x3af   : > { %1250 = vrot.lane.b32.xlu0 %v1168_v18, %s2985_s15  ;;  %v2935_v18 = vld [vmem:[%s3161_s22 + $0x48] sm:$0xff] }
 0x3b0   : > { %v1175_v26 = vsel %vm1130_vm11, %v1171_v8, %v1174_v19  ;;  %v1178_v42 = vor.u32 %v1176_v40, %v1174_v19 }
 0x3b1   : > { %v1064_v11 = vpop.permute.xlu2 %1063 }
 0x3b2   : > { %v3465_v21 = vsel %vm1081_vm9, %v2933_v0, %v1064_v11 }
 0x3b3   : > { %v1179_v14 = vshll.u32 %v3465_v21, 16  ;;  %v1304_v30 = vrot.slane %v3465_v21, 1  ;;  %v1183_v57 = vshrl.u32 %v3465_v21, 16 }
 0x3b4   : > { %v1327_v36 = vpop.permute.xlu1 %1326 }
 0x3b5   : > { %1332 = vrot.lane.b32.xlu1 %v1303_v20, %s2989_s23  ;;  %v1181_v35 = vrot.slane %v1179_v14, 1  ;;  %v1305_v39 = vsel %vm1290_vm10, %v1302_v6, %v1304_v30  ;;  %v3510_v58 = vpop.f32.mrf.mxu3 }
 0x3b7   : > { %1252 = vrot.lane.b32.xlu0 %v1175_v26, %s2985_s15  ;;  %v1182_v43 = vsel %vm1130_vm11, %v1178_v42, %v1181_v35 }
 0x3b8   : > { %v1247_v31 = vpop.permute.xlu0 %1246 }
 0x3b9   : > { %v1359_v33 = vsel %vm391_vm0, %v3387_v48, %v1247_v31  ;;  %v1066_v34 = vpop.permute.xlu2 %1065  ;;  %v1185_v48 = vor.u32 %v1183_v57, %v1181_v35  ;;  %v1239_v31 = vshrl.u32 %v3230_v29, 16 }
 0x3ba   : > { %v1392_v41 = vsel %vm1386_vm14, %v1359_v33, %v1327_v36  ;;  %v3481_v10 = vsel %vm1081_vm9, %v2934_v28, %v1066_v34 }
 0x3bb   : > { %v1186_v5 = vshll.u32 %v3481_v10, 16  ;;  %2845 = vmatmul.msk.bf16.vlgmr.msra.gmra.mxu3 %vm1450_vm15, %v1392_v41  ;;  %v1306_v27 = vrot.slane %v3481_v10, 1  ;;  %v1190_v11 = vshrl.u32 %v3481_v10, 16  ;;  %v1241_v34 = vor.u32 %v1239_v31, %v3243_v38 }
 0x3bc   : > { %v1325_v25 = vpop.permute.xlu1 %1324 }
 0x3bd   : > { %1334 = vrot.lane.b32.xlu1 %v1305_v39, %s2989_s23  ;;  %v1188_v16 = vrot.slane %v1186_v5, 1  ;;  %v1307_v15 = vsel %vm1290_vm10, %v1304_v30, %v1306_v27  ;;  %v3512_v60 = vpop.f32.mrf.mxu3 }
 0x3bf   : > { %1254 = vrot.lane.b32.xlu0 %v1182_v43, %s2985_s15  ;;  %v1189_v45 = vsel %vm1130_vm11, %v1185_v48, %v1188_v16  ;;  %v1192_v14 = vor.u32 %v1190_v11, %v1188_v16 }
 0x3c0   : > { %1256 = vrot.lane.b32.xlu2 %v1189_v45, %s2985_s15  ;;  %v1245_v1 = vpop.permute.xlu0 %1244 }
 0x3c1   : > { %v1357_v2 = vsel %vm391_vm0, %v3361_v23, %v1245_v1 }
 0x3c2   : > { %v1390_v49 = vsel %vm1386_vm14, %v1357_v2, %v1325_v25 }
 0x3c3   : > { %2787 = vmatmul.msk.bf16.vlgmr.msra.gmra.mxu1 %vm1450_vm15, %v1390_v49  ;;  %2814 = vmatmul.msk.bf16.gmra.mxu2 %vm1450_vm15, %v1390_v49 }
 0x3c4   : > { %v1329_v52 = vpop.permute.xlu1 %1328 }
 0x3c5   : > { %v3516_v61 = vpop.f32.mrf.mxu3 }
 0x3c7   : > { %1336 = vrot.lane.b32.xlu0 %v1307_v15, %s2989_s23 }
 0x3c8   : > { %v1249_v51 = vpop.permute.xlu0 %1248 }
 0x3c9   : > { %v1361_v53 = vsel %vm391_vm0, %v3383_v46, %v1249_v51 }
 0x3ca   : > { %v1394_v23 = vsel %vm1386_vm14, %v1361_v53, %v1329_v52 }
 0x3cb   : > { %2846 = vmatmul.msk.bf16.gmra.mxu3 %vm1450_vm15, %v1394_v23 }
 0x3cd   : > { %v3518_v46 = vpop.f32.mrf.mxu3 }
 0x3d3   : > { %2788 = vmatmul.msk.bf16.gmra.mxu1 %vm1450_vm15, %v1392_v41  ;;  %2815 = vmatmul.msk.bf16.gmra.mxu2 %vm1450_vm15, %v1392_v41 }
 0x3d5   : > { %v3520_v62 = vpop.f32.mrf.mxu3 }
 0x3dd   : > { %v3523_v0 = vpop.f32.mrf.mxu3 }
 0x3e3   : > { %2789 = vmatmul.msk.bf16.gmra.mxu1 %vm1450_vm15, %v1394_v23  ;;  %2816 = vmatmul.msk.bf16.gmra.mxu2 %vm1450_vm15, %v1394_v23 }
 0x3e5   : > { %v3540_v33 = vpop.f32.mrf.mxu3 }
 0x404   : > { %v1068_v13 = vpop.permute.xlu2 %1067 }
 0x405   : > { %v3526_v24 = vsel %vm1081_vm9, %v2935_v18, %v1068_v13 }
 0x406   : > { %v1193_v6 = vshll.u32 %v3526_v24, 16  ;;  %v1308_v8 = vrot.slane %v3526_v24, 1  ;;  %v1197_v20 = vshrl.u32 %v3526_v24, 16 }
 0x408   : > { %v1309_v19 = vsel %vm1290_vm10, %v1306_v27, %v1308_v8  ;;  %v1195_v36 = vrot.slane %v1193_v6, 1  ;;  %v1311_v35 = vsel %vm1290_vm10, %v1308_v8, %v1310_v54 }
 0x409   : > { %1338 = vrot.lane.b32.xlu2 %v1309_v19, %s2989_s23 }
 0x40a   : > { %v1196_v26 = vsel %vm1130_vm11, %v1192_v14, %v1195_v36  ;;  %v1199_v28 = vor.u32 %v1197_v20, %v1195_v36 }
 0x40b   : > { %1258 = vrot.lane.b32.xlu1 %v1196_v26, %s2985_s15 }
 0x40c   : > { %v1203_v30 = vsel %vm1130_vm11, %v1199_v28, %v3277_v59  ;;  %v3551_v59 = vpop.f32.mrf.mxu3 }
 0x40d   : > { %1260 = vrot.lane.b32.xlu0 %v1203_v30, %s2985_s15 }
 0x411   : > { %1272 = vrot.lane.b32.xlu2 %v1241_v34, %s2985_s15 }
 0x413   : > { %1340 = vrot.lane.b32.xlu1 %v1311_v35, %s2989_s23 }
 0x414   : > { %v3553_v41 = vpop.f32.mrf.mxu3 }
 0x415   : > { %1352 = vrot.lane.b32.xlu0 %v1320_v32, %s2989_s23 }
 0x41a   : > { %v1257_v13 = vpop.permute.xlu2 %1256 }
 0x41b   : > { %v1369_v36 = vsel %vm391_vm0, %v3465_v21, %v1257_v13 }
 0x41c   : > { %v3561_v50 = vpop.f32.mrf.mxu3 }
 0x41f   : > { %v1331_v57 = vpop.permute.xlu1 %1330 }
 0x421   : > { %v1251_v40 = vpop.permute.xlu0 %1250 }
 0x422   : > { %v1363_v38 = vsel %vm391_vm0, %v3406_v12, %v1251_v40 }
 0x423   : > { %v1396_v5 = vsel %vm1386_vm14, %v1363_v38, %v1331_v57 }
 0x424   : > { %2790 = vmatmul.msk.bf16.gmra.mxu1 %vm1450_vm15, %v1396_v5  ;;  %2817 = vmatmul.msk.bf16.gmra.mxu2 %vm1450_vm15, %v1396_v5  ;;  %v3569_v12 = vpop.f32.mrf.mxu3 }
 0x425   : > { %2847 = vmatmul.msk.bf16.gmra.mxu3 %vm1450_vm15, %v1396_v5 }
 0x427   : > { %v1333_v39 = vpop.permute.xlu1 %1332 }
 0x429   : > { %v1253_v32 = vpop.permute.xlu0 %1252 }
 0x42a   : > { %v1365_v54 = vsel %vm391_vm0, %v3441_v3, %v1253_v32 }
 0x42b   : > { %v1398_v42 = vsel %vm1386_vm14, %v1365_v54, %v1333_v39 }
 0x42f   : > { %v1335_v1 = vpop.permute.xlu1 %1334 }
 0x431   : > { %v1587_v48 = vpop.f32.mrf.mxu2  ;;  %v1255_v16 = vpop.permute.xlu0 %1254 }
 0x432   : > { %v1367_v25 = vsel %vm391_vm0, %v3453_v17, %v1255_v16  ;;  %v3580_v17 = vld [vmem:[%s3977_s5] ss:$0 sm:$0xff] }
 0x433   : > { %v1400_v3 = vsel %vm1386_vm14, %v1367_v25, %v1335_v1 }
 0x434   : > { %2791 = vmatmul.msk.bf16.gmra.mxu1 %vm1450_vm15, %v1398_v42  ;;  %2818 = vmatmul.msk.bf16.gmra.mxu2 %vm1450_vm15, %v1398_v42 }
 0x435   : > { %2848 = vmatmul.msk.bf16.gmra.mxu3 %vm1450_vm15, %v1398_v42 }
 0x439   : > { %v1589_v2 = vpop.f32.mrf.mxu2  ;;  %v1337_v11 = vpop.permute.xlu0 %1336 }
 0x43a   : > { %v1402_v30 = vsel %vm1386_vm14, %v1369_v36, %v1337_v11 }
 0x43e   : > { %v1693_v43 = vpop.f32.mrf.mxu3 }
 0x440   : > { %v1488_v45 = vpop.f32.mrf.mxu1 }
 0x441   : > { %v1588_v49 = vadd.f32 %v1587_v48, %v1488_v45 }
 0x443   : > { %v1763_v52 = vadd.f32 %v1693_v43, %v1588_v49 }
 0x444   : > { %2792 = vmatmul.msk.bf16.gmra.mxu1 %vm1450_vm15, %v1400_v3  ;;  %2819 = vmatmul.msk.bf16.gmra.mxu2 %vm1450_vm15, %v1400_v3 }
 0x445   : > { %2849 = vmatmul.msk.bf16.gmra.mxu3 %vm1450_vm15, %v1400_v3  ;;  %v1795_v6 = vadd.f32 %v3580_v17, %v1763_v52 }
 0x446   : > { %v1695_v27 = vpop.f32.mrf.mxu3  ;;  %v1592_v18 = vpop.f32.mrf.mxu2 }
 0x447   : > { %v1823_v26 = vmax.f32 %v1795_v6, 0.0 }
 0x448   : > { %v1490_v15 = vpop.f32.mrf.mxu1 }
 0x449   : > { %v1590_v51 = vadd.f32 %v1589_v2, %v1490_v15  ;;  %v1851_v34 = vpack.c.bf16 %v1823_v26, %v1823_v26 }
 0x44b   : > { %v1764_v53 = vadd.f32 %v1695_v27, %v1590_v51  ;;  %v1907_v21 = vunpack.c.l.b16 %v1851_v34  ;;  %v2896_v34 = vld [vmem:[%s3978_s6 + $0x20] sm:$0xf] }
 0x44d   : > { %v1796_v23 = vadd.f32 %v3580_v17, %v1764_v53 }
 0x44e   : > { %v1698_v8 = vpop.f32.mrf.mxu3  ;;  %v1594_v40 = vpop.f32.mrf.mxu2 }
 0x44f   : > { %v1824_v19 = vmax.f32 %v1796_v23, 0.0 }
 0x450   : > { %v1493_v20 = vpop.f32.mrf.mxu1 }
 0x451   : > { %v1593_v14 = vadd.f32 %v1592_v18, %v1493_v20  ;;  %v1852_v31 = vpack.c.bf16 %v1824_v19, %v1824_v19 }
 0x453   : > { %v1765_v28 = vadd.f32 %v1698_v8, %v1593_v14  ;;  %v1908_v38 = vunpack.c.l.b16 %v1852_v31 }
 0x454   : > { %2793 = vmatmul.msk.bf16.gmra.mxu1 %vm1450_vm15, %v1402_v30  ;;  %2820 = vmatmul.msk.bf16.gmra.mxu2 %vm1450_vm15, %v1402_v30 }
 0x455   : > { %2850 = vmatmul.msk.bf16.gmra.mxu3 %vm1450_vm15, %v1402_v30  ;;  %v1797_v35 = vadd.f32 %v3580_v17, %v1765_v28  ;;  %v3591_v42 = vpack.c.b16 %v1908_v38, %v1907_v21 }
 0x456   : > { %v1700_v32 = vpop.f32.mrf.mxu3  ;;  %v1597_v14 = vpop.f32.mrf.mxu2 }
 0x457   : > { %v1825_v54 = vmax.f32 %v1797_v35, 0.0  ;;  %v1952_v45 = vshll.u32 %v3591_v42, 16  ;;  %v1950_v49 = vshrl.u32 %v3591_v42, 16  ;;  %v2201_v35 = vld [vmem:[%s3978_s6 + $0x8] sm:$0xf] }
 0x458   : > { %v1495_v57 = vpop.f32.mrf.mxu1 }
 0x459   : > { %v1595_v5 = vadd.f32 %v1594_v40, %v1495_v57  ;;  %v1853_v16 = vpack.c.bf16 %v1825_v54, %v1825_v54  ;;  %v1954_v27 = vrot.slane %v1952_v45, 1  ;;  %v2405_v40 = vunpack.c.l.b16 %v2896_v34 }
 0x45a   : > { %v2318_v57 = vunpack.c.l.b16 %v2201_v35 }
 0x45b   : > { %v1766_v39 = vadd.f32 %v1700_v32, %v1595_v5  ;;  %v1909_v1 = vunpack.c.l.b16 %v1853_v16  ;;  %v1955_v51 = vor.u32 %v1954_v27, %v1950_v49  ;;  %v2407_v5 = vpack.c.b16 %v2405_v40, %v2405_v40 }
 0x45c   : > { %v2320_v32 = vpack.c.b16 %v2318_v57, %v2318_v57 }
 0x45d   : > { %v1798_v48 = vadd.f32 %v3580_v17, %v1766_v39  ;;  %v2412_v39 = vsel %vm2240_vm7, %v2407_v5, 0 }
 0x45e   : > { %v1599_v26 = vpop.f32.mrf.mxu2  ;;  %2420 = vmatpush.bf16.msrb.mxu2 %v2412_v39 }
 0x45f   : > { %v1826_v43 = vmax.f32 %v1798_v48, 0.0  ;;  %v2325_v48 = vsel %vm2240_vm7, %v2320_v32, 0 }
 0x460   : > { %2333 = vmatpush.bf16.msrb.mxu1 %v2325_v48 }
 0x461   : > { %v1854_v25 = vpack.c.bf16 %v1826_v43, %v1826_v43 }
 0x463   : > { %v1910_v3 = vunpack.c.l.b16 %v1854_v25  ;;  %v1339_v18 = vpop.permute.xlu2 %1338 }
 0x465   : > { %v3595_v2 = vpack.c.b16 %v1910_v3, %v1909_v1 }
 0x467   : > { %v1957_v15 = vshll.u32 %v3595_v2, 16 }
 0x469   : > { %v3599_v52 = vrot.slane %v1957_v15, 1 }
 0x46b   : > { %v1960_v53 = vsel %vm1130_vm11, %v1955_v51, %v3599_v52 }
 0x46c   : > { %2060 = vrot.lane.b32.xlu0 %v1960_v53, %s2988_s18 }
 0x47d   : > { %v1259_v23 = vpop.permute.xlu1 %1258 }
 0x47e   : > { %v1371_v13 = vsel %vm391_vm0, %v3481_v10, %v1259_v23  ;;  %v1498_v10 = vpop.f32.mrf.mxu1 }
 0x47f   : > { %v1404_v11 = vsel %vm1386_vm14, %v1371_v13, %v1339_v18  ;;  %v1261_v6 = vpop.permute.xlu0 %1260  ;;  %v1598_v28 = vadd.f32 %v1597_v14, %v1498_v10 }
 0x480   : > { %2794 = vmatmul.msk.bf16.gmra.mxu1 %vm1450_vm15, %v1404_v11  ;;  %2821 = vmatmul.msk.bf16.gmra.mxu2 %vm1450_vm15, %v1404_v11  ;;  %v1373_v20 = vsel %vm391_vm0, %v3526_v24, %v1261_v6 }
 0x481   : > { %2851 = vmatmul.msk.bf16.gmra.mxu3 %vm1450_vm15, %v1404_v11 }
 0x485   : > { %v1341_v8 = vpop.permute.xlu1 %1340 }
 0x486   : > { %v1406_v19 = vsel %vm1386_vm14, %v1373_v20, %v1341_v8  ;;  %v1500_v36 = vpop.f32.mrf.mxu1 }
 0x487   : > { %v1600_v21 = vadd.f32 %v1599_v26, %v1500_v36 }
 0x490   : > { %2795 = vmatmul.msk.bf16.gmra.mxu1 %vm1450_vm15, %v1406_v19  ;;  %2822 = vmatmul.msk.bf16.gmra.mxu2 %vm1450_vm15, %v1406_v19 }
 0x491   : > { %2852 = vmatmul.msk.bf16.gmra.mxu3 %vm1450_vm15, %v1406_v19 }
 0x4a0   : > { %2796 = vmatmul.msk.bf16.gmra.mxu1 %vm1450_vm15, %v3354_v7 }
 0x4a1   : > { %2853 = vmatmul.msk.bf16.gmra.mxu3 %vm1450_vm15, %v3354_v7  ;;  %v1503_v31 = vpop.f32.mrf.mxu1  ;;  %v1602_v7 = vpop.f32.mrf.mxu2 }
 0x4a2   : > { %v1603_v27 = vadd.f32 %v1602_v7, %v1503_v31 }
 0x4a8   : > { %v1703_v24 = vpop.f32.mrf.mxu3 }
 0x4a9   : > { %v1767_v30 = vadd.f32 %v1703_v24, %v1598_v28  ;;  %v1505_v45 = vpop.f32.mrf.mxu1  ;;  %v1604_v15 = vpop.f32.mrf.mxu2 }
 0x4aa   : > { %v1605_v20 = vadd.f32 %v1604_v15, %v1505_v45 }
 0x4ab   : > { %v1799_v38 = vadd.f32 %v3580_v17, %v1767_v30 }
 0x4ad   : > { %v1827_v16 = vmax.f32 %v1799_v38, 0.0 }
 0x4af   : > { %v1855_v1 = vpack.c.bf16 %v1827_v16, %v1827_v16 }
 0x4b0   : > { %v1705_v54 = vpop.f32.mrf.mxu3 }
 0x4b1   : > { %v1768_v43 = vadd.f32 %v1705_v54, %v1600_v21  ;;  %2854 = vmatmul.msk.bf16.gmra.mxu3 %vm1450_vm15, %v3266_v47  ;;  %v1911_v53 = vunpack.c.l.b16 %v1855_v1  ;;  %v2089_v47 = vrot.slane %v3595_v2, 1  ;;  %v1508_v8 = vpop.f32.mrf.mxu1  ;;  %v1607_v10 = vpop.f32.mrf.mxu2 }
 0x4b2   : > { %v1608_v31 = vadd.f32 %v1607_v10, %v1508_v8  ;;  %v2088_v10 = vrot.slane %v3591_v42, 1 }
 0x4b3   : > { %v1800_v25 = vadd.f32 %v3580_v17, %v1768_v43 }
 0x4b5   : > { %v1828_v3 = vmax.f32 %v1800_v25, 0.0 }
 0x4b7   : > { %v1856_v49 = vpack.c.bf16 %v1828_v3, %v1828_v3 }
 0x4b8   : > { %v1708_v51 = vpop.f32.mrf.mxu3 }
 0x4b9   : > { %v1912_v23 = vunpack.c.l.b16 %v1856_v49  ;;  %v1769_v18 = vadd.f32 %v1708_v51, %v1603_v27  ;;  %v1510_v40 = vpop.f32.mrf.mxu1  ;;  %v1609_v32 = vpop.f32.mrf.mxu2 }
 0x4ba   : > { %v1610_v1 = vadd.f32 %v1609_v32, %v1510_v40 }
 0x4bb   : > { %v3632_v13 = vpack.c.b16 %v1912_v23, %v1911_v53  ;;  %v1801_v11 = vadd.f32 %v3580_v17, %v1769_v18 }
 0x4bd   : > { %v2091_v6 = vrot.slane %v3632_v13, 1  ;;  %v1829_v36 = vmax.f32 %v1801_v11, 0.0  ;;  %v1965_v35 = vshll.u32 %v3632_v13, 16  ;;  %v1969_v43 = vshrl.u32 %v3632_v13, 16 }
 0x4bf   : > { %v2092_v19 = vsel %vm1290_vm10, %v2089_v47, %v2091_v6  ;;  %v1857_v24 = vpack.c.bf16 %v1829_v36, %v1829_v36  ;;  %v1967_v54 = vrot.slane %v1965_v35, 1 }
 0x4c0   : > { %2117 = vrot.lane.b32.xlu0 %v2092_v19, %s2985_s15  ;;  %v1710_v14 = vpop.f32.mrf.mxu3 }
 0x4c1   : > { %v1770_v26 = vadd.f32 %v1710_v14, %v1605_v20  ;;  %2855 = vmatmul.msk.bf16.gmra.mxu3 %vm1450_vm15, %v3297_v22  ;;  %v1913_v38 = vunpack.c.l.b16 %v1857_v24  ;;  %v2861_v22 = vld [vmem:[%s3978_s6 + $0x14] sm:$0xf]  ;;  %v1971_v27 = vor.u32 %v1969_v43, %v1967_v54  ;;  %v1513_v11 = vpop.f32.mrf.mxu1  ;;  %v1612_v8 = vpop.f32.mrf.mxu2  ;;  %v1961_v14 = vshrl.u32 %v3595_v2, 16 }
 0x4c2   : > { %v2211_v39 = vunpack.c.l.b16 %v2861_v22  ;;  %v1613_v36 = vadd.f32 %v1612_v8, %v1513_v11 }
 0x4c3   : > { %v1802_v28 = vadd.f32 %v3580_v17, %v1770_v26 }
 0x4c4   : > { %v2213_v45 = vpack.c.b16 %v2211_v39, %v2211_v39 }
 0x4c5   : > { %v1830_v30 = vmax.f32 %v1802_v28, 0.0  ;;  %v2090_v28 = vsel %vm1290_vm10, %v2088_v10, %v2089_v47 }
 0x4c6   : > { %v2242_v51 = vsel %vm2240_vm7, %v2213_v45, 0 }
 0x4c7   : > { %v1858_v34 = vpack.c.bf16 %v1830_v30, %v1830_v30  ;;  %2250 = vmatpush.bf16.msrb.mxu0 %v2242_v51 }
 0x4c8   : > { %v1713_v57 = vpop.f32.mrf.mxu3 }
 0x4c9   : > { %v1914_v7 = vunpack.c.l.b16 %v1858_v34  ;;  %v1771_v5 = vadd.f32 %v1713_v57, %v1608_v31  ;;  %v1515_v57 = vpop.f32.mrf.mxu1 }
 0x4cb   : > { %v3643_v21 = vpack.c.b16 %v1914_v7, %v1913_v38  ;;  %v1803_v48 = vadd.f32 %v3580_v17, %v1771_v5  ;;  %v1614_v5 = vpop.f32.mrf.mxu2 }
 0x4cc   : > { %v1615_v32 = vadd.f32 %v1614_v5, %v1515_v57 }
 0x4cd   : > { %v2093_v16 = vrot.slane %v3643_v21, 1  ;;  %v1973_v25 = vshll.u32 %v3643_v21, 16  ;;  %v1831_v53 = vmax.f32 %v1803_v48, 0.0  ;;  %v1977_v47 = vshrl.u32 %v3643_v21, 16 }
 0x4cf   : > { %v2094_v3 = vsel %vm1290_vm10, %v2091_v6, %v2093_v16  ;;  %v1975_v49 = vrot.slane %v1973_v25, 1  ;;  %v1859_v20 = vpack.c.bf16 %v1831_v53, %v1831_v53  ;;  %v1273_v53 = vpop.permute.xlu2 %1272 }
 0x4d0   : > { %2119 = vrot.lane.b32.xlu2 %v2094_v3, %s2985_s15  ;;  %v1715_v15 = vpop.f32.mrf.mxu3 }
 0x4d1   : > { %v1772_v23 = vadd.f32 %v1715_v15, %v1610_v1  ;;  %2856 = vmatmul.msk.bf16.gmra.mxu3 %vm1450_vm15, %v3321_v44  ;;  %v1976_v18 = vsel %vm1130_vm11, %v1971_v27, %v1975_v49  ;;  %v1963_v44 = vor.u32 %v1961_v14, %v3599_v52  ;;  %v1915_v30 = vunpack.c.l.b16 %v1859_v20 }
 0x4d2   : > { %2064 = vrot.lane.b32.xlu1 %v1976_v18, %s2988_s18  ;;  %v1979_v39 = vor.u32 %v1977_v47, %v1975_v49 }
 0x4d3   : > { %v1804_v6 = vadd.f32 %v3580_v17, %v1772_v23  ;;  %v1968_v35 = vsel %vm1130_vm11, %v1963_v44, %v1967_v54  ;;  %v1353_v23 = vpop.permute.xlu0 %1352 }
 0x4d5   : > { %v1832_v19 = vmax.f32 %v1804_v6, 0.0  ;;  %v1385_v6 = vsel %vm391_vm0, %v3230_v29, %v1273_v53  ;;  %v2953_v29 = vld [vmem:[%s3978_s6 + $0x18] sm:$0xff] }
 0x4d6   : > { %v1418_v10 = vsel %vm1386_vm14, %v1385_v6, %v1353_v23  ;;  %2421 = vmatpush.bf16.msrb.mxu2 %v2953_v29 }
 0x4d7   : > { %v1860_v26 = vpack.c.bf16 %v1832_v19, %v1832_v19 }
 0x4d8   : > { %2115 = vrot.lane.b32.xlu2 %v2090_v28, %s2985_s15  ;;  %v1718_v24 = vpop.f32.mrf.mxu3  ;;  %v2951_v28 = vld [vmem:[%s3978_s6] sm:$0xff] }
 0x4d9   : > { %v1916_v31 = vunpack.c.l.b16 %v1860_v26  ;;  %v1773_v34 = vadd.f32 %v1718_v24, %v1613_v36  ;;  %v1518_v36 = vpop.f32.mrf.mxu1  ;;  %v1617_v26 = vpop.f32.mrf.mxu2  ;;  %2334 = vmatpush.bf16.msrb.mxu1 %v2951_v28 }
 0x4da   : > { %2062 = vrot.lane.b32.xlu1 %v1968_v35, %s2988_s18 }
 0x4db   : > { %v3667_v40 = vpack.c.b16 %v1916_v31, %v1915_v30  ;;  %v1805_v38 = vadd.f32 %v3580_v17, %v1773_v34  ;;  %v1618_v30 = vadd.f32 %v1617_v26, %v1518_v36 }
 0x4dd   : > { %v2095_v7 = vrot.slane %v3667_v40, 1  ;;  %v1981_v52 = vshll.u32 %v3667_v40, 16  ;;  %v1833_v43 = vmax.f32 %v1805_v38, 0.0  ;;  %v1985_v11 = vshrl.u32 %v3667_v40, 16 }
 0x4df   : > { %v2096_v22 = vsel %vm1290_vm10, %v2093_v16, %v2095_v7  ;;  %v1983_v48 = vrot.slane %v1981_v52, 1  ;;  %v1861_v3 = vpack.c.bf16 %v1833_v43, %v1833_v43 }
 0x4e0   : > { %2121 = vrot.lane.b32.xlu2 %v2096_v22, %s2985_s15  ;;  %v1720_v54 = vpop.f32.mrf.mxu3 }
 0x4e1   : > { %v1774_v25 = vadd.f32 %v1720_v54, %v1615_v32  ;;  %2857 = vmatmul.msk.bf16.gmra.mxu3 %vm1450_vm15, %v3338_v63  ;;  %v1984_v45 = vsel %vm1130_vm11, %v1979_v39, %v1983_v48  ;;  %v1917_v16 = vunpack.c.l.b16 %v1861_v3  ;;  %v1987_v20 = vor.u32 %v1985_v11, %v1983_v48  ;;  %v1520_v44 = vpop.f32.mrf.mxu1  ;;  %v1619_v24 = vpop.f32.mrf.mxu2  ;;  %v2952_v32 = vld [vmem:[%s3978_s6 + $0xc] sm:$0xff] }
 0x4e2   : > { %2066 = vrot.lane.b32.xlu1 %v1984_v45, %s2988_s18  ;;  %2251 = vmatpush.bf16.msrb.mxu0 %v2952_v32 }
 0x4e3   : > { %v1806_v1 = vadd.f32 %v3580_v17, %v1774_v25 }
 0x4e5   : > { %v1834_v27 = vmax.f32 %v1806_v1, 0.0 }
 0x4e7   : > { %v1862_v15 = vpack.c.bf16 %v1834_v27, %v1834_v27 }
 0x4e9   : > { %v1918_v49 = vunpack.c.l.b16 %v1862_v15  ;;  %v1622_v38 = vpop.f32.mrf.mxu2 }
 0x4eb   : > { %v3680_v51 = vpack.c.b16 %v1918_v49, %v1917_v16 }
 0x4ed   : > { %v2097_v18 = vrot.slane %v3680_v51, 1  ;;  %v1989_v63 = vshll.u32 %v3680_v51, 16  ;;  %v1993_v23 = vshrl.u32 %v3680_v51, 16 }
 0x4ef   : > { %v2098_v8 = vsel %vm1290_vm10, %v2095_v7, %v2097_v18  ;;  %v1991_v19 = vrot.slane %v1989_v63, 1  ;;  %v1620_v7 = vadd.f32 %v1619_v24, %v1520_v44 }
 0x4f0   : > { %2123 = vrot.lane.b32.xlu1 %v2098_v8, %s2985_s15 }
 0x4f1   : > { %2858 = vmatmul.msk.bf16.gmra.mxu3 %vm1450_vm15, %v1418_v10  ;;  %v1992_v14 = vsel %vm1130_vm11, %v1987_v20, %v1991_v19  ;;  %v1624_v45 = vpop.f32.mrf.mxu2  ;;  %v1995_v20 = vor.u32 %v1993_v23, %v1991_v19 }
 0x4f2   : > { %2068 = vrot.lane.b32.xlu0 %v1992_v14, %s2988_s18 }
 0x4fd   : > { %v1523_v35 = vpop.f32.mrf.mxu1 }
 0x4fe   : > { %v1623_v43 = vadd.f32 %v1622_v38, %v1523_v35 }
 0x503   : > { %v1627_v14 = vpop.f32.mrf.mxu2 }
 0x504   : > { %v1723_v31 = vpop.f32.mrf.mxu3 }
 0x505   : > { %v1775_v34 = vadd.f32 %v1723_v31, %v1618_v30  ;;  %v1525_v39 = vpop.f32.mrf.mxu1 }
 0x506   : > { %v1625_v6 = vadd.f32 %v1624_v45, %v1525_v39 }
 0x507   : > { %v1807_v57 = vadd.f32 %v3580_v17, %v1775_v34 }
 0x509   : > { %v1835_v52 = vmax.f32 %v1807_v57, 0.0 }
 0x50b   : > { %v1863_v48 = vpack.c.bf16 %v1835_v52, %v1835_v52 }
 0x50c   : > { %v1725_v47 = vpop.f32.mrf.mxu3 }
 0x50d   : > { %v1776_v5 = vadd.f32 %v1725_v47, %v1620_v7  ;;  %v1919_v3 = vunpack.c.l.b16 %v1863_v48  ;;  %v1528_v63 = vpop.f32.mrf.mxu1  ;;  %v1629_v7 = vpop.f32.mrf.mxu2 }
 0x50e   : > { %v1628_v31 = vadd.f32 %v1627_v14, %v1528_v63 }
 0x50f   : > { %v1808_v22 = vadd.f32 %v3580_v17, %v1776_v5 }
 0x511   : > { %v1836_v54 = vmax.f32 %v1808_v22, 0.0 }
 0x513   : > { %v1864_v25 = vpack.c.bf16 %v1836_v54, %v1836_v54 }
 0x514   : > { %v1728_v1 = vpop.f32.mrf.mxu3 }
 0x515   : > { %v1920_v27 = vunpack.c.l.b16 %v1864_v25  ;;  %v1777_v15 = vadd.f32 %v1728_v1, %v1623_v43  ;;  %v1530_v35 = vpop.f32.mrf.mxu1 }
 0x516   : > { %v1630_v48 = vadd.f32 %v1629_v7, %v1530_v35 }
 0x517   : > { %v3704_v16 = vpack.c.b16 %v1920_v27, %v1919_v3  ;;  %v1809_v49 = vadd.f32 %v3580_v17, %v1777_v15 }
 0x519   : > { %v2099_v53 = vrot.slane %v3704_v16, 1  ;;  %v1997_v11 = vshll.u32 %v3704_v16, 16  ;;  %v1837_v26 = vmax.f32 %v1809_v49, 0.0  ;;  %v2001_v32 = vshrl.u32 %v3704_v16, 16  ;;  %v2061_v49 = vpop.permute.xlu0 %2060 }
 0x51b   : > { %v2100_v8 = vsel %vm1290_vm10, %v2097_v18, %v2099_v53  ;;  %v1999_v10 = vrot.slane %v1997_v11, 1  ;;  %v1865_v24 = vpack.c.bf16 %v1837_v26, %v1837_v26  ;;  %v1632_v11 = vpop.f32.mrf.mxu2 }
 0x51c   : > { %2125 = vrot.lane.b32.xlu0 %v2100_v8, %s2985_s15  ;;  %v1730_v36 = vpop.f32.mrf.mxu3 }
 0x51d   : > { %v1778_v29 = vadd.f32 %v1730_v36, %v1625_v6  ;;  %v2000_v28 = vsel %vm1130_vm11, %v1995_v20, %v1999_v10  ;;  %v1921_v19 = vunpack.c.l.b16 %v1865_v24  ;;  %v2003_v43 = vor.u32 %v2001_v32, %v1999_v10  ;;  %v1533_v15 = vpop.f32.mrf.mxu1 }
 0x51e   : > { %2070 = vrot.lane.b32.xlu2 %v2000_v28, %s2988_s18  ;;  %v1633_v20 = vadd.f32 %v1632_v11, %v1533_v15 }
 0x51f   : > { %v1810_v44 = vadd.f32 %v3580_v17, %v1778_v29 }
 0x521   : > { %v1838_v30 = vmax.f32 %v1810_v44, 0.0 }
 0x523   : > { %v1866_v34 = vpack.c.bf16 %v1838_v30, %v1838_v30  ;;  %v1634_v35 = vpop.f32.mrf.mxu2 }
 0x524   : > { %v1733_v18 = vpop.f32.mrf.mxu3 }
 0x525   : > { %v1922_v57 = vunpack.c.l.b16 %v1866_v34  ;;  %v1779_v38 = vadd.f32 %v1733_v18, %v1628_v31  ;;  %v1535_v24 = vpop.f32.mrf.mxu1 }
 0x526   : > { %v1635_v18 = vadd.f32 %v1634_v35, %v1535_v24 }
 0x527   : > { %v3715_v47 = vpack.c.b16 %v1922_v57, %v1921_v19  ;;  %v1811_v52 = vadd.f32 %v3580_v17, %v1779_v38 }
 0x529   : > { %v2101_v5 = vrot.slane %v3715_v47, 1  ;;  %v2005_v22 = vshll.u32 %v3715_v47, 16  ;;  %v1839_v1 = vmax.f32 %v1811_v52, 0.0 }
 0x52a   : > { %v2120_v39 = vpop.permute.xlu2 %2119 }
 0x52b   : > { %v2102_v54 = vsel %vm1290_vm10, %v2099_v53, %v2101_v5  ;;  %v2007_v25 = vrot.slane %v2005_v22, 1  ;;  %v1867_v63 = vpack.c.bf16 %v1839_v1, %v1839_v1  ;;  %v2144_v53 = vsel %vm1081_vm9, %v3591_v42, %v2061_v49 }
 0x52c   : > { %2127 = vrot.lane.b32.xlu2 %v2102_v54, %s2985_s15  ;;  %v1735_v45 = vpop.f32.mrf.mxu3  ;;  %v2009_v42 = vshrl.u32 %v3715_v47, 16 }
 0x52d   : > { %v1780_v3 = vadd.f32 %v1735_v45, %v1630_v48  ;;  %v2008_v27 = vsel %vm1130_vm11, %v2003_v43, %v2007_v25  ;;  %v1923_v26 = vunpack.c.l.b16 %v1867_v63  ;;  %v1638_v45 = vadd.f32 %v3518_v46, %v3436_v9 }
 0x52e   : > { %2072 = vrot.lane.b32.xlu1 %v2008_v27, %s2988_s18  ;;  %v2011_v57 = vor.u32 %v2009_v42, %v2007_v25 }
 0x52f   : > { %v1812_v23 = vadd.f32 %v3580_v17, %v1780_v3 }
 0x531   : > { %v1840_v6 = vmax.f32 %v1812_v23, 0.0 }
 0x532   : > { %v2116_v8 = vpop.permute.xlu2 %2115 }
 0x533   : > { %v1868_v10 = vpack.c.bf16 %v1840_v6, %v1840_v6  ;;  %v2172_v14 = vsel %vm391_vm0, %v2144_v53, %v2116_v8  ;;  %v1640_v53 = vadd.f32 %v3520_v62, %v3447_v55 }
 0x534   : > { %v1738_v36 = vpop.f32.mrf.mxu3  ;;  %2882 = vmatmul.msk.bf16.vlgmr.msrb.gmra.mxu1 %vm2215_vm8, %v2172_v14  ;;  %v2118_v14 = vpop.permute.xlu0 %2117 }
 0x535   : > { %v1924_v29 = vunpack.c.l.b16 %v1868_v10  ;;  %v1781_v28 = vadd.f32 %v1738_v36, %v1633_v20 }
 0x537   : > { %v3730_v44 = vpack.c.b16 %v1924_v29, %v1923_v26  ;;  %v1813_v30 = vadd.f32 %v3580_v17, %v1781_v28 }
 0x539   : > { %v2103_v31 = vrot.slane %v3730_v44, 1  ;;  %v2013_v34 = vshll.u32 %v3730_v44, 16  ;;  %v1841_v52 = vmax.f32 %v1813_v30, 0.0  ;;  %v2017_v9 = vshrl.u32 %v3730_v44, 16 }
 0x53a   : > { %v2122_v35 = vpop.permute.xlu2 %2121 }
 0x53b   : > { %v2104_v19 = vsel %vm1290_vm10, %v2101_v5, %v2103_v31  ;;  %v2015_v38 = vrot.slane %v2013_v34, 1  ;;  %v1869_v54 = vpack.c.bf16 %v1841_v52, %v1841_v52 }
 0x53c   : > { %v1740_v7 = vpop.f32.mrf.mxu3  ;;  %2129 = vrot.lane.b32.xlu1 %v2104_v19, %s2985_s15 }
 0x53d   : > { %v1782_v32 = vadd.f32 %v1740_v7, %v1635_v18  ;;  %v2016_v22 = vsel %vm1130_vm11, %v2011_v57, %v2015_v38  ;;  %v1925_v3 = vunpack.c.l.b16 %v1869_v54 }
 0x53e   : > { %2074 = vrot.lane.b32.xlu0 %v2016_v22, %s2988_s18 }
 0x53f   : > { %v1814_v48 = vadd.f32 %v3580_v17, %v1782_v32 }
 0x541   : > { %v1842_v43 = vmax.f32 %v1814_v48, 0.0  ;;  %v1645_v48 = vadd.f32 %v3540_v33, %v3491_v37 }
 0x543   : > { %v1870_v1 = vpack.c.bf16 %v1842_v43, %v1842_v43 }
 0x544   : > { %v1743_v5 = vpop.f32.mrf.mxu3  ;;  %v2065_v25 = vpop.permute.xlu1 %2064 }
 0x545   : > { %v1926_v27 = vunpack.c.l.b16 %v1870_v1  ;;  %v1783_v15 = vadd.f32 %v1743_v5, %v1638_v45  ;;  %v2148_v49 = vsel %vm1081_vm9, %v3632_v13, %v2065_v25  ;;  %v2019_v13 = vor.u32 %v2017_v9, %v2015_v38 }
 0x546   : > { %v2176_v23 = vsel %vm391_vm0, %v2148_v49, %v2120_v39 }
 0x547   : > { %v3746_v11 = vpack.c.b16 %v1926_v27, %v1925_v3  ;;  %2901 = vmatmul.msk.bf16.vlgmr.msrb.gmra.mxu2 %vm2215_vm8, %v2176_v23  ;;  %v1815_v63 = vadd.f32 %v3580_v17, %v1783_v15  ;;  %v1648_v27 = vadd.f32 %v3551_v59, %v3504_v56 }
 0x549   : > { %v2105_v6 = vrot.slane %v3746_v11, 1  ;;  %v2021_v46 = vshll.u32 %v3746_v11, 16  ;;  %v1843_v36 = vmax.f32 %v1815_v63, 0.0 }
 0x54b   : > { %v2106_v8 = vsel %vm1290_vm10, %v2103_v31, %v2105_v6  ;;  %v2023_v20 = vrot.slane %v2021_v46, 1  ;;  %v1871_v24 = vpack.c.bf16 %v1843_v36, %v1843_v36  ;;  %v1643_v31 = vadd.f32 %v3523_v0, %v3470_v4 }
 0x54c   : > { %v1745_v39 = vpop.f32.mrf.mxu3  ;;  %2131 = vrot.lane.b32.xlu0 %v2106_v8, %s2985_s15  ;;  %v2063_v10 = vpop.permute.xlu1 %2062  ;;  %v2025_v0 = vshrl.u32 %v3746_v11, 16 }
 0x54d   : > { %v1784_v26 = vadd.f32 %v1745_v39, %v1640_v53  ;;  %v2146_v29 = vsel %vm1081_vm9, %v3595_v2, %v2063_v10  ;;  %v2024_v28 = vsel %vm1130_vm11, %v2019_v13, %v2023_v20  ;;  %v1927_v18 = vunpack.c.l.b16 %v1871_v24 }
 0x54e   : > { %2076 = vrot.lane.b32.xlu2 %v2024_v28, %s2988_s18  ;;  %v2174_v55 = vsel %vm391_vm0, %v2146_v29, %v2118_v14  ;;  %v1650_v10 = vadd.f32 %v3553_v41, %v3510_v58  ;;  %v1653_v24 = vadd.f32 %v3561_v50, %v3512_v60 }
 0x54f   : > { %v1816_v62 = vadd.f32 %v3580_v17, %v1784_v26  ;;  %2866 = vmatmul.msk.bf16.vlgmr.msrb.gmra.mxu0 %vm2215_vm8, %v2174_v55  ;;  %2883 = vmatmul.msk.bf16.gmra.mxu1 %vm2215_vm8, %v2174_v55 }
 0x551   : > { %v1844_v30 = vmax.f32 %v1816_v62, 0.0 }
 0x553   : > { %v1872_v42 = vpack.c.bf16 %v1844_v30, %v1844_v30 }
 0x554   : > { %v1748_v34 = vpop.f32.mrf.mxu3  ;;  %v2067_v2 = vpop.permute.xlu1 %2066 }
 0x555   : > { %v1928_v19 = vunpack.c.l.b16 %v1872_v42  ;;  %v1785_v57 = vadd.f32 %v1748_v34, %v1643_v31  ;;  %v2150_v38 = vsel %vm1081_vm9, %v3643_v21, %v2067_v2  ;;  %v2027_v21 = vor.u32 %v2025_v0, %v2023_v20 }
 0x556   : > { %v2178_v7 = vsel %vm391_vm0, %v2150_v38, %v2122_v35 }
 0x557   : > { %v3770_v52 = vpack.c.b16 %v1928_v19, %v1927_v18  ;;  %2902 = vmatmul.msk.bf16.gmra.mxu2 %vm2215_vm8, %v2178_v7  ;;  %v1817_v32 = vadd.f32 %v3580_v17, %v1785_v57 }
 0x559   : > { %v2107_v4 = vrot.slane %v3770_v52, 1  ;;  %v2029_v22 = vshll.u32 %v3770_v52, 16  ;;  %v1845_v1 = vmax.f32 %v1817_v32, 0.0  ;;  %v2033_v59 = vshrl.u32 %v3770_v52, 16 }
 0x55b   : > { %v2108_v54 = vsel %vm1290_vm10, %v2105_v6, %v2107_v4  ;;  %v2031_v43 = vrot.slane %v2029_v22, 1  ;;  %v1873_v37 = vpack.c.bf16 %v1845_v1, %v1845_v1 }
 0x55c   : > { %v1750_v45 = vpop.f32.mrf.mxu3  ;;  %2133 = vrot.lane.b32.xlu2 %v2108_v54, %s2985_s15 }
 0x55d   : > { %v1786_v5 = vadd.f32 %v1750_v45, %v1645_v48  ;;  %v2032_v25 = vsel %vm1130_vm11, %v2027_v21, %v2031_v43  ;;  %v1929_v6 = vunpack.c.l.b16 %v1873_v37  ;;  %v2035_v14 = vor.u32 %v2033_v59, %v2031_v43 }
 0x55e   : > { %2078 = vrot.lane.b32.xlu1 %v2032_v25, %s2988_s18 }
 0x55f   : > { %v1818_v3 = vadd.f32 %v3580_v17, %v1786_v5  ;;  %2867 = vmatmul.msk.bf16.gmra.mxu0 %vm2215_vm8, %v2176_v23  ;;  %2884 = vmatmul.msk.bf16.gmra.mxu1 %vm2215_vm8, %v2176_v23 }
 0x561   : > { %v1846_v33 = vmax.f32 %v1818_v3, 0.0 }
 0x562   : > { %v2124_v46 = vpop.permute.xlu1 %2123 }
 0x563   : > { %v1874_v15 = vpack.c.bf16 %v1846_v33, %v1846_v33 }
 0x564   : > { %v2069_v49 = vpop.permute.xlu0 %2068  ;;  %v1753_v63 = vpop.f32.mrf.mxu3 }
 0x565   : > { %v1930_v9 = vunpack.c.l.b16 %v1874_v15  ;;  %v2152_v53 = vsel %vm1081_vm9, %v3667_v40, %v2069_v49  ;;  %v1787_v8 = vadd.f32 %v1753_v63, %v1648_v27 }
 0x566   : > { %v2180_v13 = vsel %vm391_vm0, %v2152_v53, %v2124_v46 }
 0x567   : > { %v3791_v20 = vpack.c.b16 %v1930_v9, %v1929_v6  ;;  %2903 = vmatmul.msk.bf16.gmra.mxu2 %vm2215_vm8, %v2180_v13  ;;  %v1819_v23 = vadd.f32 %v3580_v17, %v1787_v8 }
 0x569   : > { %v2109_v56 = vrot.slane %v3791_v20, 1  ;;  %v2037_v39 = vshll.u32 %v3791_v20, 16  ;;  %v1847_v29 = vmax.f32 %v1819_v23, 0.0  ;;  %v2041_v57 = vshrl.u32 %v3791_v20, 16 }
 0x56b   : > { %v2110_v40 = vsel %vm1290_vm10, %v2107_v4, %v2109_v56  ;;  %v2039_v36 = vrot.slane %v2037_v39, 1  ;;  %v1875_v58 = vpack.c.bf16 %v1847_v29, %v1847_v29 }
 0x56c   : > { %v1755_v26 = vpop.f32.mrf.mxu3  ;;  %2135 = vrot.lane.b32.xlu1 %v2110_v40, %s2985_s15 }
 0x56d   : > { %v1788_v28 = vadd.f32 %v1755_v26, %v1650_v10  ;;  %v2040_v55 = vsel %vm1130_vm11, %v2035_v14, %v2039_v36  ;;  %v1931_v42 = vunpack.c.l.b16 %v1875_v58  ;;  %v2043_v50 = vor.u32 %v2041_v57, %v2039_v36 }
 0x56e   : > { %2080 = vrot.lane.b32.xlu0 %v2040_v55, %s2988_s18  ;;  %v3863_v55 = vld [vmem:[%s3979_s7] ss:$0 sm:$0xff] }
 0x56f   : > { %v1820_v62 = vadd.f32 %v3580_v17, %v1788_v28  ;;  %2868 = vmatmul.msk.bf16.gmra.mxu0 %vm2215_vm8, %v2178_v7  ;;  %2885 = vmatmul.msk.bf16.gmra.mxu1 %vm2215_vm8, %v2178_v7  ;;  %v1655_v7 = vadd.f32 %v3569_v12, %v3516_v61 }
 0x571   : > { %v1848_v41 = vmax.f32 %v1820_v62, 0.0 }
 0x573   : > { %v1876_v30 = vpack.c.bf16 %v1848_v41, %v1848_v41 }
 0x574   : > { %v1758_v31 = vpop.f32.mrf.mxu3 }
 0x575   : > { %v1932_v34 = vunpack.c.l.b16 %v1876_v30  ;;  %v1789_v2 = vadd.f32 %v1758_v31, %v1653_v24 }
 0x577   : > { %v3809_v35 = vpack.c.b16 %v1932_v34, %v1931_v42  ;;  %v1821_v18 = vadd.f32 %v3580_v17, %v1789_v2 }
 0x578   : > { %v2071_v37 = vpop.permute.xlu2 %2070 }
 0x579   : > { %v2111_v19 = vrot.slane %v3809_v35, 1  ;;  %v2045_v38 = vshll.u32 %v3809_v35, 16  ;;  %v1849_v0 = vmax.f32 %v1821_v18, 0.0  ;;  %v2049_v25 = vshrl.u32 %v3809_v35, 16 }
 0x57a   : > { %v2154_v6 = vsel %vm1081_vm9, %v3680_v51, %v2071_v37 }
 0x57b   : > { %v2112_v60 = vsel %vm1290_vm10, %v2109_v56, %v2111_v19  ;;  %v2047_v32 = vrot.slane %v2045_v38, 1  ;;  %v1877_v61 = vpack.c.bf16 %v1849_v0, %v1849_v0 }
 0x57c   : > { %v1760_v4 = vpop.f32.mrf.mxu3  ;;  %2137 = vrot.lane.b32.xlu0 %v2112_v60, %s2985_s15 }
 0x57d   : > { %v1790_v22 = vadd.f32 %v1760_v4, %v1655_v7  ;;  %v2048_v48 = vsel %vm1130_vm11, %v2043_v50, %v2047_v32  ;;  %v1933_v43 = vunpack.c.l.b16 %v1877_v61  ;;  %v2051_v33 = vor.u32 %v2049_v25, %v2047_v32 }
 0x57e   : > { %2082 = vrot.lane.b32.xlu2 %v2048_v48, %s2988_s18 }
 0x57f   : > { %v1822_v54 = vadd.f32 %v3580_v17, %v1790_v22  ;;  %2869 = vmatmul.msk.bf16.gmra.mxu0 %vm2215_vm8, %v2180_v13  ;;  %2886 = vmatmul.msk.bf16.gmra.mxu1 %vm2215_vm8, %v2180_v13 }
 0x581   : > { %v1850_v12 = vmax.f32 %v1822_v54, 0.0 }
 0x583   : > { %v1878_v21 = vpack.c.bf16 %v1850_v12, %v1850_v12 }
 0x585   : > { %v1934_v45 = vunpack.c.l.b16 %v1878_v21 }
 0x586   : > { %v2128_v8 = vpop.permute.xlu2 %2127 }
 0x587   : > { %v3824_v1 = vpack.c.b16 %v1934_v45, %v1933_v43 }
 0x589   : > { %v2113_v5 = vrot.slane %v3824_v1, 1  ;;  %v2053_v3 = vshll.u32 %v3824_v1, 16  ;;  %v2057_v15 = vshrl.u32 %v3824_v1, 16 }
 0x58b   : > { %v2114_v17 = vsel %vm1290_vm10, %v2111_v19, %v2113_v5  ;;  %v2055_v27 = vrot.slane %v2053_v3, 1 }
 0x58c   : > { %2139 = vrot.lane.b32.xlu2 %v2114_v17, %s2985_s15 }
 0x58d   : > { %v2056_v49 = vsel %vm1130_vm11, %v2051_v33, %v2055_v27  ;;  %v2059_v63 = vor.u32 %v2057_v15, %v2055_v27 }
 0x58e   : > { %v2126_v9 = vpop.permute.xlu0 %2125  ;;  %2084 = vrot.lane.b32.xlu1 %v2056_v49, %s2988_s18 }
 0x58f   : > { %v2182_v46 = vsel %vm391_vm0, %v2154_v6, %v2126_v9  ;;  %2086 = vrot.lane.b32.xlu0 %v2059_v63, %s2988_s18 }
 0x590   : > { %2870 = vmatmul.msk.bf16.gmra.mxu0 %vm2215_vm8, %v2182_v46  ;;  %2887 = vmatmul.msk.bf16.gmra.mxu1 %vm2215_vm8, %v2182_v46 }
 0x591   : > { %2904 = vmatmul.msk.bf16.gmra.mxu2 %vm2215_vm8, %v2182_v46 }
 0x596   : > { %2141 = vrot.lane.b32.xlu1 %v2113_v5, %s2985_s15 }
 0x5a0   : > { %v2073_v53 = vpop.permute.xlu1 %2072 }
 0x5a1   : > { %v2156_v51 = vsel %vm1081_vm9, %v3704_v16, %v2073_v53 }
 0x5a2   : > { %v2184_v13 = vsel %vm391_vm0, %v2156_v51, %v2128_v8 }
 0x5a3   : > { %2871 = vmatmul.msk.bf16.gmra.mxu0 %vm2215_vm8, %v2184_v13  ;;  %2888 = vmatmul.msk.bf16.gmra.mxu1 %vm2215_vm8, %v2184_v13 }
 0x5a4   : > { %2905 = vmatmul.msk.bf16.gmra.mxu2 %vm2215_vm8, %v2184_v13 }
 0x5a8   : > { %v2077_v10 = vpop.permute.xlu2 %2076 }
 0x5a9   : > { %v2160_v14 = vsel %vm1081_vm9, %v3730_v44, %v2077_v10 }
 0x5ae   : > { %v2130_v56 = vpop.permute.xlu1 %2129 }
 0x5b0   : > { %v2075_v23 = vpop.permute.xlu0 %2074 }
 0x5b1   : > { %v2158_v59 = vsel %vm1081_vm9, %v3715_v47, %v2075_v23  ;;  %v2336_v16 = vpop.f32.mrf.mxu1 }
 0x5b2   : > { %v2186_v39 = vsel %vm391_vm0, %v2158_v59, %v2130_v56 }
 0x5b3   : > { %2872 = vmatmul.msk.bf16.gmra.mxu0 %vm2215_vm8, %v2186_v39  ;;  %2889 = vmatmul.msk.bf16.gmra.mxu1 %vm2215_vm8, %v2186_v39 }
 0x5b4   : > { %2906 = vmatmul.msk.bf16.gmra.mxu2 %vm2215_vm8, %v2186_v39 }
 0x5b6   : > { %v2134_v41 = vpop.permute.xlu2 %2133 }
 0x5b9   : > { %v2338_v47 = vpop.f32.mrf.mxu1 }
 0x5be   : > { %v2132_v40 = vpop.permute.xlu0 %2131 }
 0x5bf   : > { %v2188_v36 = vsel %vm391_vm0, %v2160_v14, %v2132_v40 }
 0x5c3   : > { %2873 = vmatmul.msk.bf16.gmra.mxu0 %vm2215_vm8, %v2188_v36  ;;  %2890 = vmatmul.msk.bf16.gmra.mxu1 %vm2215_vm8, %v2188_v36 }
 0x5c4   : > { %2907 = vmatmul.msk.bf16.gmra.mxu2 %vm2215_vm8, %v2188_v36 }
 0x5ca   : > { %v2423_v26 = vpop.f32.mrf.mxu2 }
 0x5cc   : > { %v2253_v29 = vpop.f32.mrf.mxu0  ;;  %v2341_v62 = vpop.f32.mrf.mxu1 }
 0x5cd   : > { %v2337_v28 = vadd.f32 %v2336_v16, %v2253_v29 }
 0x5cf   : > { %v2483_v44 = vadd.f32 %v2423_v26, %v2337_v28 }
 0x5d0   : > { %v2079_v58 = vpop.permute.xlu1 %2078 }
 0x5d1   : > { %v2511_v24 = vadd.f32 %v3863_v55, %v2483_v44  ;;  %v2162_v30 = vsel %vm1081_vm9, %v3746_v11, %v2079_v58 }
 0x5d2   : > { %v2425_v31 = vpop.f32.mrf.mxu2  ;;  %v2190_v42 = vsel %vm391_vm0, %v2162_v30, %v2134_v41 }
 0x5d3   : > { %v2535_v34 = vmax.f32 %v2511_v24, 0.0  ;;  %2874 = vmatmul.msk.bf16.gmra.mxu0 %vm2215_vm8, %v2190_v42  ;;  %2891 = vmatmul.msk.bf16.gmra.mxu1 %vm2215_vm8, %v2190_v42 }
 0x5d4   : > { %2908 = vmatmul.msk.bf16.gmra.mxu2 %vm2215_vm8, %v2190_v42  ;;  %v2255_v2 = vpop.f32.mrf.mxu0  ;;  %v2343_v19 = vpop.f32.mrf.mxu1 }
 0x5d5   : > { %2559 = vst.msk [vmem:[%s3872_s25] sm:$0xff] %vm1081_vm9, %v2535_v34  ;;  %v2339_v11 = vadd.f32 %v2338_v47, %v2255_v2 }
 0x5d7   : > { %v2484_v18 = vadd.f32 %v2425_v31, %v2339_v11 }
 0x5d8   : > { %v2083_v27 = vpop.permute.xlu2 %2082 }
 0x5d9   : > { %v2512_v57 = vadd.f32 %v3863_v55, %v2484_v18  ;;  %v2166_v63 = vsel %vm1081_vm9, %v3791_v20, %v2083_v27 }
 0x5da   : > { %v2428_v38 = vpop.f32.mrf.mxu2 }
 0x5db   : > { %v2536_v7 = vmax.f32 %v2512_v57, 0.0 }
 0x5dc   : > { %v2258_v60 = vpop.f32.mrf.mxu0  ;;  %v2346_v22 = vpop.f32.mrf.mxu1 }
 0x5dd   : > { %2560 = vst.msk [vmem:[%s3872_s25 + $0x8] sm:$0xff] %vm1081_vm9, %v2536_v7  ;;  %v2342_v50 = vadd.f32 %v2341_v62, %v2258_v60 }
 0x5de   : > { %v2136_v48 = vpop.permute.xlu1 %2135 }
 0x5df   : > { %v2485_v32 = vadd.f32 %v2428_v38, %v2342_v50 }
 0x5e0   : > { %v2081_v4 = vpop.permute.xlu0 %2080 }
 0x5e1   : > { %v2513_v0 = vadd.f32 %v3863_v55, %v2485_v32  ;;  %v2164_v54 = vsel %vm1081_vm9, %v3770_v52, %v2081_v4 }
 0x5e2   : > { %v2430_v61 = vpop.f32.mrf.mxu2  ;;  %v2192_v12 = vsel %vm391_vm0, %v2164_v54, %v2136_v48 }
 0x5e3   : > { %v2537_v21 = vmax.f32 %v2513_v0, 0.0  ;;  %2875 = vmatmul.msk.bf16.gmra.mxu0 %vm2215_vm8, %v2192_v12  ;;  %2892 = vmatmul.msk.bf16.gmra.mxu1 %vm2215_vm8, %v2192_v12 }
 0x5e4   : > { %2909 = vmatmul.msk.bf16.gmra.mxu2 %vm2215_vm8, %v2192_v12  ;;  %v2260_v43 = vpop.f32.mrf.mxu0  ;;  %v2348_v52 = vpop.f32.mrf.mxu1 }
 0x5e5   : > { %2561 = vst.msk [vmem:[%s3872_s25 + $0x10] sm:$0xff] %vm1081_vm9, %v2537_v21  ;;  %v2344_v45 = vadd.f32 %v2343_v19, %v2260_v43 }
 0x5e6   : > { %v2140_v10 = vpop.permute.xlu2 %2139 }
 0x5e7   : > { %v2486_v5 = vadd.f32 %v2430_v61, %v2344_v45 }
 0x5e9   : > { %v2514_v25 = vadd.f32 %v3863_v55, %v2486_v5 }
 0x5ea   : > { %v2433_v37 = vpop.f32.mrf.mxu2 }
 0x5eb   : > { %v2538_v3 = vmax.f32 %v2514_v25, 0.0 }
 0x5ec   : > { %v2263_v17 = vpop.f32.mrf.mxu0  ;;  %v2351_v8 = vpop.f32.mrf.mxu1 }
 0x5ed   : > { %2562 = vst.msk [vmem:[%s3872_s25 + $0x18] sm:$0xff] %vm1081_vm9, %v2538_v3  ;;  %v2347_v33 = vadd.f32 %v2346_v22, %v2263_v17 }
 0x5ee   : > { %v2138_v49 = vpop.permute.xlu0 %2137 }
 0x5ef   : > { %v2487_v15 = vadd.f32 %v2433_v37, %v2347_v33  ;;  %v2194_v9 = vsel %vm391_vm0, %v2166_v63, %v2138_v49 }
 0x5f1   : > { %v2515_v6 = vadd.f32 %v3863_v55, %v2487_v15 }
 0x5f2   : > { %v2435_v13 = vpop.f32.mrf.mxu2 }
 0x5f3   : > { %v2539_v46 = vmax.f32 %v2515_v6, 0.0  ;;  %2876 = vmatmul.msk.bf16.gmra.mxu0 %vm2215_vm8, %v2194_v9  ;;  %2893 = vmatmul.msk.bf16.gmra.mxu1 %vm2215_vm8, %v2194_v9 }
 0x5f4   : > { %2910 = vmatmul.msk.bf16.gmra.mxu2 %vm2215_vm8, %v2194_v9  ;;  %v2265_v53 = vpop.f32.mrf.mxu0  ;;  %v2353_v39 = vpop.f32.mrf.mxu1 }
 0x5f5   : > { %2563 = vst.msk [vmem:[%s3872_s25 + $0x20] sm:$0xff] %vm1081_vm9, %v2539_v46  ;;  %v2349_v51 = vadd.f32 %v2348_v52, %v2265_v53 }
 0x5f7   : > { %v2488_v23 = vadd.f32 %v2435_v13, %v2349_v51 }
 0x5f9   : > { %v2516_v20 = vadd.f32 %v3863_v55, %v2488_v23 }
 0x5fb   : > { %v2540_v56 = vmax.f32 %v2516_v20, 0.0 }
 0x5fc   : > { %v2268_v59 = vpop.f32.mrf.mxu0  ;;  %v2356_v47 = vpop.f32.mrf.mxu1 }
 0x5fd   : > { %2564 = vst.msk [vmem:[%s3872_s25 + $0x28] sm:$0xff] %vm1081_vm9, %v2540_v56  ;;  %v2352_v44 = vadd.f32 %v2351_v8, %v2268_v59 }
 0x600   : > { %v2085_v16 = vpop.permute.xlu1 %2084 }
 0x601   : > { %v2168_v40 = vsel %vm1081_vm9, %v3809_v35, %v2085_v16  ;;  %v2087_v29 = vpop.permute.xlu0 %2086 }
 0x602   : > { %v2196_v14 = vsel %vm391_vm0, %v2168_v40, %v2140_v10  ;;  %v2170_v62 = vsel %vm1081_vm9, %v3824_v1, %v2087_v29 }
 0x603   : > { %2877 = vmatmul.msk.bf16.gmra.mxu0 %vm2215_vm8, %v2196_v14 }
 0x604   : > { %2911 = vmatmul.msk.bf16.gmra.mxu2 %vm2215_vm8, %v2196_v14  ;;  %v2270_v36 = vpop.f32.mrf.mxu0  ;;  %v2358_v58 = vpop.f32.mrf.mxu1 }
 0x605   : > { %v2354_v34 = vadd.f32 %v2353_v39, %v2270_v36 }
 0x608   : > { %v2142_v28 = vpop.permute.xlu1 %2141 }
 0x609   : > { %v2198_v35 = vsel %vm391_vm0, %v2170_v62, %v2142_v28  ;;  %vm2582_vm0 = vcmask 60416  }
 0x60d   : > { %v2273_v26 = vpop.f32.mrf.mxu0  ;;  %v2361_v11 = vpop.f32.mrf.mxu1 }
 0x60e   : > { %v2357_v38 = vadd.f32 %v2356_v47, %v2273_v26 }
 0x614   : > { %v2438_v41 = vpop.f32.mrf.mxu2  ;;  %2912 = vmatmul.msk.bf16.gmra.mxu2 %vm2215_vm8, %v2198_v35 }
 0x615   : > { %v2489_v24 = vadd.f32 %v2438_v41, %v2352_v44  ;;  %v2275_v31 = vpop.f32.mrf.mxu0  ;;  %v2363_v7 = vpop.f32.mrf.mxu1 }
 0x616   : > { %v2359_v22 = vadd.f32 %v2358_v58, %v2275_v31 }
 0x617   : > { %v2517_v30 = vadd.f32 %v3863_v55, %v2489_v24 }
 0x619   : > { %v2541_v42 = vmax.f32 %v2517_v30, 0.0 }
 0x61b   : > { %2565 = vst.msk [vmem:[%s3872_s25 + $0x30] sm:$0xff] %vm1081_vm9, %v2541_v42 }
 0x61c   : > { %v2440_v2 = vpop.f32.mrf.mxu2 }
 0x61d   : > { %v2490_v1 = vadd.f32 %v2440_v2, %v2354_v34 }
 0x61f   : > { %v2518_v18 = vadd.f32 %v3863_v55, %v2490_v1 }
 0x620   : > { %v2278_v19 = vpop.f32.mrf.mxu0  ;;  %v2366_v48 = vpop.f32.mrf.mxu1 }
 0x621   : > { %v2542_v57 = vmax.f32 %v2518_v18, 0.0  ;;  %v2362_v45 = vadd.f32 %v2361_v11, %v2278_v19 }
 0x623   : > { %2566 = vst.msk [vmem:[%s3872_s25 + $0x38] sm:$0xff] %vm1081_vm9, %v2542_v57 }
 0x627   : > { %v2443_v60 = vpop.f32.mrf.mxu2 }
 0x628   : > { %v2491_v50 = vadd.f32 %v2443_v60, %v2357_v38  ;;  %v2280_v32 = vpop.f32.mrf.mxu0  ;;  %v2368_v52 = vpop.f32.mrf.mxu1 }
 0x629   : > { %v2364_v33 = vadd.f32 %v2363_v7, %v2280_v32 }
 0x62a   : > { %v2519_v4 = vadd.f32 %v3863_v55, %v2491_v50 }
 0x62c   : > { %v2543_v0 = vmax.f32 %v2519_v4, 0.0 }
 0x62e   : > { %2567 = vst.msk [vmem:[%s3872_s25 + $0x40] sm:$0xff] %vm1081_vm9, %v2543_v0 }
 0x62f   : > { %v2445_v54 = vpop.f32.mrf.mxu2 }
 0x630   : > { %v2492_v61 = vadd.f32 %v2445_v54, %v2359_v22  ;;  %v2283_v12 = vpop.f32.mrf.mxu0  ;;  %v2371_v6 = vpop.f32.mrf.mxu1 }
 0x631   : > { %v2367_v46 = vadd.f32 %v2366_v48, %v2283_v12 }
 0x632   : > { %v2520_v21 = vadd.f32 %v3863_v55, %v2492_v61 }
 0x634   : > { %v2544_v43 = vmax.f32 %v2520_v21, 0.0 }
 0x636   : > { %2568 = vst.msk [vmem:[%s3872_s25 + $0x48] sm:$0xff] %vm1081_vm9, %v2544_v43 }
 0x637   : > { %v2448_v5 = vpop.f32.mrf.mxu2 }
 0x638   : > { %v2493_v25 = vadd.f32 %v2448_v5, %v2362_v45  ;;  %v2285_v3 = vpop.f32.mrf.mxu0  ;;  %v2373_v20 = vpop.f32.mrf.mxu1 }
 0x639   : > { %v2369_v56 = vadd.f32 %v2368_v52, %v2285_v3 }
 0x63a   : > { %v2521_v37 = vadd.f32 %v3863_v55, %v2493_v25 }
 0x63c   : > { %v2545_v17 = vmax.f32 %v2521_v37, 0.0 }
 0x63e   : > { %2569 = vst.msk [vmem:[%s3872_s25 + $0x50] sm:$0xff] %vm1081_vm9, %v2545_v17 }
 0x63f   : > { %v2450_v27 = vpop.f32.mrf.mxu2 }
 0x640   : > { %v2494_v15 = vadd.f32 %v2450_v27, %v2364_v33  ;;  %v2288_v49 = vpop.f32.mrf.mxu0  ;;  %v2376_v36 = vpop.f32.mrf.mxu1 }
 0x641   : > { %v2372_v14 = vadd.f32 %v2371_v6, %v2288_v49 }
 0x642   : > { %v2522_v63 = vadd.f32 %v3863_v55, %v2494_v15 }
 0x644   : > { %v2546_v9 = vmax.f32 %v2522_v63, 0.0 }
 0x646   : > { %2570 = vst.msk [vmem:[%s3872_s25 + $0x58] sm:$0xff] %vm1081_vm9, %v2546_v9 }
 0x647   : > { %v2453_v53 = vpop.f32.mrf.mxu2 }
 0x648   : > { %v2495_v8 = vadd.f32 %v2453_v53, %v2367_v46  ;;  %v2290_v13 = vpop.f32.mrf.mxu0  ;;  %v2378_v41 = vpop.f32.mrf.mxu1 }
 0x649   : > { %v2374_v62 = vadd.f32 %v2373_v20, %v2290_v13 }
 0x64a   : > { %v2523_v51 = vadd.f32 %v3863_v55, %v2495_v8 }
 0x64c   : > { %v2547_v23 = vmax.f32 %v2523_v51, 0.0 }
 0x64e   : > { %2571 = vst.msk [vmem:[%s3872_s25 + $0x60] sm:$0xff] %vm1081_vm9, %v2547_v23 }
 0x64f   : > { %v2455_v59 = vpop.f32.mrf.mxu2 }
 0x650   : > { %v2496_v39 = vadd.f32 %v2455_v59, %v2369_v56  ;;  %v2293_v40 = vpop.f32.mrf.mxu0  ;;  %v2381_v1 = vpop.f32.mrf.mxu1 }
 0x651   : > { %v2377_v31 = vadd.f32 %v2376_v36, %v2293_v40 }
 0x652   : > { %v2524_v16 = vadd.f32 %v3863_v55, %v2496_v39 }
 0x654   : > { %v2548_v10 = vmax.f32 %v2524_v16, 0.0 }
 0x656   : > { %2572 = vst.msk [vmem:[%s3872_s25 + $0x68] sm:$0xff] %vm1081_vm9, %v2548_v10 }
 0x657   : > { %v2458_v47 = vpop.f32.mrf.mxu2 }
 0x658   : > { %v2497_v26 = vadd.f32 %v2458_v47, %v2372_v14  ;;  %v2295_v44 = vpop.f32.mrf.mxu0  ;;  %v2383_v32 = vpop.f32.mrf.mxu1 }
 0x659   : > { %v2379_v19 = vadd.f32 %v2378_v41, %v2295_v44 }
 0x65a   : > { %v2525_v29 = vadd.f32 %v3863_v55, %v2497_v26 }
 0x65c   : > { %v2549_v28 = vmax.f32 %v2525_v29, 0.0 }
 0x65e   : > { %2573 = vst.msk [vmem:[%s3872_s25 + $0x70] sm:$0xff] %vm1081_vm9, %v2549_v28 }
 0x65f   : > { %v2460_v58 = vpop.f32.mrf.mxu2 }
 0x660   : > { %v2498_v35 = vadd.f32 %v2460_v58, %v2374_v62  ;;  %v2298_v2 = vpop.f32.mrf.mxu0  ;;  %v2386_v21 = vpop.f32.mrf.mxu1 }
 0x661   : > { %v2382_v4 = vadd.f32 %v2381_v1, %v2298_v2 }
 0x662   : > { %v2526_v24 = vadd.f32 %v3863_v55, %v2498_v35 }
 0x664   : > { %v2550_v30 = vmax.f32 %v2526_v24, 0.0 }
 0x666   : > { %2574 = vst.msk [vmem:[%s3872_s25 + $0x78] sm:$0xff] %vm1081_vm9, %v2550_v30 }
 0x667   : > { %v2463_v42 = vpop.f32.mrf.mxu2 }
 0x668   : > { %v2499_v34 = vadd.f32 %v2463_v42, %v2377_v31  ;;  %v2300_v60 = vpop.f32.mrf.mxu0  ;;  %v2388_v33 = vpop.f32.mrf.mxu1 }
 0x669   : > { %v2384_v12 = vadd.f32 %v2383_v32, %v2300_v60 }
 0x66a   : > { %v2527_v11 = vadd.f32 %v3863_v55, %v2499_v34 }
 0x66c   : > { %v2551_v18 = vmax.f32 %v2527_v11, 0.0 }
 0x66e   : > { %2575 = vst.msk [vmem:[%s3872_s25 + $0x80] sm:$0xff] %vm1081_vm9, %v2551_v18 }
 0x66f   : > { %v2465_v57 = vpop.f32.mrf.mxu2 }
 0x670   : > { %v2500_v38 = vadd.f32 %v2465_v57, %v2379_v19  ;;  %v2303_v61 = vpop.f32.mrf.mxu0  ;;  %v2391_v53 = vpop.f32.mrf.mxu1 }
 0x671   : > { %v2387_v3 = vadd.f32 %v2386_v21, %v2303_v61 }
 0x672   : > { %v2528_v7 = vadd.f32 %v3863_v55, %v2500_v38 }
 0x674   : > { %v2552_v50 = vmax.f32 %v2528_v7, 0.0 }
 0x676   : > { %2576 = vst.msk [vmem:[%s3872_s25 + $0x88] sm:$0xff] %vm1081_vm9, %v2552_v50 }
 0x677   : > { %v2468_v0 = vpop.f32.mrf.mxu2 }
 0x678   : > { %v2501_v22 = vadd.f32 %v2468_v0, %v2382_v4  ;;  %v2305_v52 = vpop.f32.mrf.mxu0  ;;  %v2393_v39 = vpop.f32.mrf.mxu1 }
 0x679   : > { %v2389_v49 = vadd.f32 %v2388_v33, %v2305_v52 }
 0x67a   : > { %v2529_v48 = vadd.f32 %v3863_v55, %v2501_v22 }
 0x67c   : > { %v2553_v54 = vmax.f32 %v2529_v48, 0.0 }
 0x67e   : > { %2577 = vst.msk [vmem:[%s3872_s25 + $0x90] sm:$0xff] %vm1081_vm9, %v2553_v54 }
 0x67f   : > { %v2470_v43 = vpop.f32.mrf.mxu2 }
 0x680   : > { %v2502_v45 = vadd.f32 %v2470_v43, %v2384_v12  ;;  %v2308_v9 = vpop.f32.mrf.mxu0 }
 0x681   : > { %v2392_v51 = vadd.f32 %v2391_v53, %v2308_v9 }
 0x682   : > { %v2530_v5 = vadd.f32 %v3863_v55, %v2502_v45 }
 0x684   : > { %v2554_v25 = vmax.f32 %v2530_v5, 0.0 }
 0x686   : > { %2578 = vst.msk [vmem:[%s3872_s25 + $0x98] sm:$0xff] %vm1081_vm9, %v2554_v25 }
 0x687   : > { %v2473_v37 = vpop.f32.mrf.mxu2 }
 0x688   : > { %v2503_v17 = vadd.f32 %v2473_v37, %v2387_v3  ;;  %v2310_v56 = vpop.f32.mrf.mxu0 }
 0x689   : > { %v2394_v16 = vadd.f32 %v2393_v39, %v2310_v56 }
 0x68a   : > { %v2531_v27 = vadd.f32 %v3863_v55, %v2503_v17 }
 0x68c   : > { %v2555_v15 = vmax.f32 %v2531_v27, 0.0 }
 0x68e   : > { %2579 = vst.msk [vmem:[%s3872_s25 + $0xa0] sm:$0xff] %vm1081_vm9, %v2555_v15 }
 0x68f   : > { %v2475_v63 = vpop.f32.mrf.mxu2 }
 0x690   : > { %v2504_v6 = vadd.f32 %v2475_v63, %v2389_v49 }
 0x692   : > { %v2532_v46 = vadd.f32 %v3863_v55, %v2504_v6 }
 0x694   : > { %v2556_v8 = vmax.f32 %v2532_v46, 0.0 }
 0x696   : > { %2580 = vst.msk [vmem:[%s3872_s25 + $0xa8] sm:$0xff] %vm1081_vm9, %v2556_v8 }
 0x697   : > { %v2478_v13 = vpop.f32.mrf.mxu2 }
 0x698   : > { %v2505_v23 = vadd.f32 %v2478_v13, %v2392_v51 }
 0x69a   : > { %v2533_v20 = vadd.f32 %v3863_v55, %v2505_v23 }
 0x69c   : > { %v2557_v59 = vmax.f32 %v2533_v20, 0.0 }
 0x69e   : > { %2581 = vst.msk [vmem:[%s3872_s25 + $0xb0] sm:$0xff] %vm1081_vm9, %v2557_v59 }
 0x69f   : > { %v2480_v10 = vpop.f32.mrf.mxu2 }
 0x6a0   : > { %v2506_v40 = vadd.f32 %v2480_v10, %v2394_v16 }
 0x6a2   : > { %v2534_v14 = vadd.f32 %v3863_v55, %v2506_v40 }
 0x6a4   : > { %v2558_v36 = vmax.f32 %v2534_v14, 0.0 }
 0x6a6   : > { %2583 = vst.msk [vmem:[%s3872_s25 + $0xb8] sm:$0xf] %vm2582_vm0, %v2558_v36 }
 0x6a7 PF: > { %s18_s27 = sadd.s32 1, %s2983_s27  }
 0x6a8   : > { %p15_p4 = scmp.ge.s32.totalorder %s18_s27, 4  }
 0x6aa   :  { %17 = sbr.rel (!%p15_p4) target bundleno = 1 (0x1), region = 89 }

</bundles_post_ra>
